<compile_context>
chip_gen: v7x
topology: tpu7x:2x2x1
jax: 0.10.0
libtpu: 0.0.40
codegen_flags: <defaults>
</compile_context>

<pallas_src>
import math

import jax
import jax.numpy as jnp
from jax.experimental import pallas as pl
from jax.experimental.pallas import tpu as pltpu

_GELU_COEF = 0.7978845608028654  # sqrt(2 / pi)
_VMEM_LIMIT_CACHE = [None]


def _vmem_limit_bytes():
    """Generation-aware scoped-VMEM cap: 96 MiB on v5e/v6e (128 MiB physical),
    48 MiB on v7x (64 MiB physical) / unknown parts."""
    if _VMEM_LIMIT_CACHE[0] is None:
        kind = ""
        try:
            kind = jax.devices()[0].device_kind.lower()
        except Exception:
            pass
        if any(tag in kind for tag in ("v2", "v3", "v4", "v5", "v6")):
            _VMEM_LIMIT_CACHE[0] = 96 * 1024 * 1024
        else:
            _VMEM_LIMIT_CACHE[0] = 48 * 1024 * 1024
    return _VMEM_LIMIT_CACHE[0]


def _prod(xs):
    out = 1
    for v in xs:
        out *= v
    return out


def _round_up(x, m):
    return ((x + m - 1) // m) * m


def _pick_tile(dim, candidates=(512, 256, 128)):
    # Prefer 256+ wide tiles (v6e/v7x MXU is 2x(256x256)); 128 still fine on v5e.
    for c in candidates:
        if dim % c == 0:
            return c
    return dim  # full extent (always a legal block)


# ----------------------------------------------------------------------------
# Standalone LayerNorm (torch: mean / var(unbiased=False) over dim=-1, eps=1e-5)
# Only used once per forward (first ln1 on the embedding output); all other
# LayerNorms are fused into the preceding linear's epilogue.
# ----------------------------------------------------------------------------
def _layernorm_kernel(x_ref, scale_ref, shift_ref, o_ref):
    x = x_ref[...].astype(jnp.float32)
    d = x.shape[-1]
    mean = jnp.sum(x, axis=-1, keepdims=True) * (1.0 / d)
    cen = x - mean
    var = jnp.sum(cen * cen, axis=-1, keepdims=True) * (1.0 / d)  # two-pass, f32
    inv = jax.lax.rsqrt(var + 1e-5)
    out = cen * inv * scale_ref[...].astype(jnp.float32) + shift_ref[...].astype(jnp.float32)
    o_ref[...] = out.astype(o_ref.dtype)


def layer_norm(x, scale, shift, *, tile_rows=1024):
    orig_shape = x.shape
    D = orig_shape[-1]
    rows = _prod(orig_shape[:-1])
    x2 = x.reshape(rows, D)

    tr = min(tile_rows, _round_up(rows, 8))
    rows_p = _round_up(rows, tr)
    if rows_p != rows:
        x2 = jnp.pad(x2, ((0, rows_p - rows), (0, 0)))

    out = pl.pallas_call(
        _layernorm_kernel,
        out_shape=jax.ShapeDtypeStruct((rows_p, D), x.dtype),
        grid_spec=pltpu.PrefetchScalarGridSpec(
            num_scalar_prefetch=0,
            grid=(rows_p // tr,),
            in_specs=[
                pl.BlockSpec((tr, D), lambda i: (i, 0)),
                pl.BlockSpec((1, D), lambda i: (0, 0)),  # constant block index
                pl.BlockSpec((1, D), lambda i: (0, 0)),
            ],
            out_specs=pl.BlockSpec((tr, D), lambda i: (i, 0)),
        ),
        compiler_params=pltpu.CompilerParams(
            dimension_semantics=("parallel",),
            vmem_limit_bytes=_vmem_limit_bytes(),
        ),
    )(x2, scale.reshape(1, D), shift.reshape(1, D))

    if rows_p != rows:
        out = out[:rows]
    return out.reshape(orig_shape)


# ----------------------------------------------------------------------------
# Linear (x @ W) with fused bias / tanh-GELU / residual / LayerNorm epilogue
# ----------------------------------------------------------------------------
def _gelu_tanh(x):
    return 0.5 * x * (1.0 + jnp.tanh(_GELU_COEF * (x + 0.044715 * x * x * x)))


def _make_linear_kernel(has_bias, has_residual, activation, has_ln):
    def kernel(*refs):
        idx = 0
        x_ref = refs[idx]; idx += 1
        w_ref = refs[idx]; idx += 1
        bias_ref = None
        res_ref = None
        ln_scale_ref = None
        ln_shift_ref = None
        if has_bias:
            bias_ref = refs[idx]; idx += 1
        if has_residual:
            res_ref = refs[idx]; idx += 1
        if has_ln:
            ln_scale_ref = refs[idx]; idx += 1
            ln_shift_ref = refs[idx]; idx += 1
        o_ref = refs[idx]; idx += 1
        ln_o_ref = None
        if has_ln:
            ln_o_ref = refs[idx]; idx += 1
        acc_ref = refs[idx]

        k = pl.program_id(2)

        @pl.when(k == 0)
        def _init():
            acc_ref[...] = jnp.zeros_like(acc_ref)

        # bf16 x bf16 MXU matmul, f32 accumulation.
        acc_ref[...] += jnp.dot(
            x_ref[...].astype(jnp.bfloat16),
            w_ref[...].astype(jnp.bfloat16),
            preferred_element_type=jnp.float32,
        )

        @pl.when(k == pl.num_programs(2) - 1)
        def _finish():
            out = acc_ref[...]
            if has_bias:
                out = out + bias_ref[...].astype(jnp.float32)
            if activation == "gelu":
                out = _gelu_tanh(out)
            if has_residual:
                out = out + res_ref[...].astype(jnp.float32)
            o_ref[...] = out.astype(o_ref.dtype)
            if has_ln:
                # Fused LayerNorm over the full feature dim (tn == N), two-pass.
                d = out.shape[-1]
                mean = jnp.sum(out, axis=-1, keepdims=True) * (1.0 / d)
                cen = out - mean
                var = jnp.sum(cen * cen, axis=-1, keepdims=True) * (1.0 / d)
                inv = jax.lax.rsqrt(var + 1e-5)
                ln_out = (cen * inv * ln_scale_ref[...].astype(jnp.float32)
                          + ln_shift_ref[...].astype(jnp.float32))
                ln_o_ref[...] = ln_out.astype(ln_o_ref.dtype)

    return kernel


def linear(x, w, bias=None, *, activation=None, residual=None,
           ln_scale=None, ln_shift=None, tile_m=256):
    """out = act(x @ w + bias) + residual; optionally also returns LayerNorm(out)."""
    orig_lead = x.shape[:-1]
    K = x.shape[-1]
    K2, N = w.shape
    assert K == K2
    has_ln = ln_scale is not None

    # LN fusion needs the full feature row in one tile; fall back if N is not
    # a lane multiple (never happens in this model where N == emb_dim).
    if has_ln and (N % 128 != 0):
        out = linear(x, w, bias, activation=activation, residual=residual, tile_m=tile_m)
        return out, layer_norm(out, ln_scale, ln_shift)

    M = _prod(orig_lead)
    x2 = x.reshape(M, K)
    res2 = residual.reshape(M, N) if residual is not None else None

    # Pad N to a lane multiple (handles e.g. a real 50257 vocab without letting
    # tn fall back to the full extent and blowing VMEM).
    Np = _round_up(N, 128)
    w2 = w
    b2 = bias
    if Np != N:
        w2 = jnp.pad(w, ((0, 0), (0, Np - N)))
        if bias is not None:
            b2 = jnp.pad(bias, ((0, Np - N),))
        if res2 is not None:
            res2 = jnp.pad(res2, ((0, 0), (0, Np - N)))
    w2 = w2.astype(jnp.bfloat16)  # weights stream as bf16 (params already bf16)

    tn = Np if has_ln else _pick_tile(Np)
    tk = _pick_tile(K)

    tm = min(tile_m, _round_up(M, 8))
    # Ensure >= 2 M tiles when possible so v7x's two TensorCores both get work.
    if _round_up(M, tm) // tm < 2 and tm > 8:
        tm = max(8, _round_up(tm // 2, 8))
    Mp = _round_up(M, tm)
    if Mp != M:
        pad = Mp - M
        x2 = jnp.pad(x2, ((0, pad), (0, 0)))
        if res2 is not None:
            res2 = jnp.pad(res2, ((0, pad), (0, 0)))

    has_bias = bias is not None
    has_res = res2 is not None

    in_specs = [
        pl.BlockSpec((tm, tk), lambda i, j, k: (i, k)),
        # TODO(synk): on v5e, pipeline_mode=pl.Buffered(3) on this weight spec
        # helps hide the weight stream for skinny-M (decode-like) shapes.
        pl.BlockSpec((tk, tn), lambda i, j, k: (k, j)),
    ]
    inputs = [x2, w2]
    if has_bias:
        in_specs.append(pl.BlockSpec((1, tn), lambda i, j, k: (0, j)))
        inputs.append(b2.reshape(1, Np))
    if has_res:
        in_specs.append(pl.BlockSpec((tm, tn), lambda i, j, k: (i, j)))
        inputs.append(res2)
    if has_ln:
        in_specs.append(pl.BlockSpec((1, tn), lambda i, j, k: (0, j)))
        inputs.append(ln_scale.reshape(1, N))
        in_specs.append(pl.BlockSpec((1, tn), lambda i, j, k: (0, j)))
        inputs.append(ln_shift.reshape(1, N))

    out_block = pl.BlockSpec((tm, tn), lambda i, j, k: (i, j))
    if has_ln:
        out_shape = (jax.ShapeDtypeStruct((Mp, Np), x.dtype),
                     jax.ShapeDtypeStruct((Mp, Np), x.dtype))
        out_specs = (out_block, pl.BlockSpec((tm, tn), lambda i, j, k: (i, j)))
    else:
        out_shape = jax.ShapeDtypeStruct((Mp, Np), x.dtype)
        out_specs = out_block

    result = pl.pallas_call(
        _make_linear_kernel(has_bias, has_res, activation, has_ln),
        out_shape=out_shape,
        grid_spec=pltpu.PrefetchScalarGridSpec(
            num_scalar_prefetch=0,
            grid=(Mp // tm, Np // tn, K // tk),
            in_specs=in_specs,
            out_specs=out_specs,
            scratch_shapes=[pltpu.VMEM((tm, tn), jnp.float32)],
        ),
        compiler_params=pltpu.CompilerParams(
            dimension_semantics=("parallel", "parallel", "arbitrary"),
            vmem_limit_bytes=_vmem_limit_bytes(),
        ),
    )(*inputs)

    def _trim(o):
        if Mp != M or Np != N:
            o = o[:M, :N]
        return o.reshape(orig_lead + (N,))

    if has_ln:
        return _trim(result[0]), _trim(result[1])
    return _trim(result)


# ----------------------------------------------------------------------------
# Causal multi-head attention: one batch per grid step, all heads together.
# Reads Q/K/V straight from the fused (B, S, 3D) qkv tensor; writes a
# lane-dense (1, S, D) output block.
# ----------------------------------------------------------------------------
def _make_attention_kernel(num_heads):
    def kernel(qkv_ref, o_ref):
        qkv = qkv_ref[0]                       # (S, 3D), f32 activations
        s, d3 = qkv.shape
        d = d3 // 3
        dh = d // num_heads
        scale = 1.0 / math.sqrt(dh)

        row = jax.lax.broadcasted_iota(jnp.int32, (s, s), 0)
        col = jax.lax.broadcasted_iota(jnp.int32, (s, s), 1)
        keep = col <= row                      # causal mask

        ctx_heads = []
        for h in range(num_heads):
            # Scale Q (S x Dh) instead of scores (S x S); bf16 MXU operands.
            q = (qkv[:, h * dh:(h + 1) * dh].astype(jnp.float32) * scale
                 ).astype(jnp.bfloat16)
            k = qkv[:, d + h * dh:d + (h + 1) * dh].astype(jnp.bfloat16)
            v = qkv[:, 2 * d + h * dh:2 * d + (h + 1) * dh].astype(jnp.bfloat16)

            # Contract last dims directly (no explicit k.T / XLU transpose).
            scores = jax.lax.dot_general(
                q, k, (((1,), (1,)), ((), ())),
                preferred_element_type=jnp.float32)
            scores = jnp.where(keep, scores, -1e30)

            m = jnp.max(scores, axis=-1, keepdims=True)
            p = jnp.exp(scores - m)
            denom = jnp.sum(p, axis=-1, keepdims=True)
            probs = p * pl.reciprocal(denom, approx=True)

            ctx = jnp.dot(probs.astype(jnp.bfloat16), v,
                          preferred_element_type=jnp.float32)
            ctx_heads.append(ctx)

        # TODO(synk): for long contexts (S*S*4B approaching VMEM) switch to a
        # KV-tiled online-softmax (flash) variant; full-S scores are fine here.
        o_ref[0] = jnp.concatenate(ctx_heads, axis=-1).astype(o_ref.dtype)

    return kernel


def causal_attention(qkv, num_heads):
    B, S, D3 = qkv.shape
    D = D3 // 3

    return pl.pallas_call(
        _make_attention_kernel(num_heads),
        out_shape=jax.ShapeDtypeStruct((B, S, D), qkv.dtype),
        grid_spec=pltpu.PrefetchScalarGridSpec(
            num_scalar_prefetch=0,
            grid=(B,),
            in_specs=[pl.BlockSpec((1, S, D3), lambda b: (b, 0, 0))],
            out_specs=pl.BlockSpec((1, S, D), lambda b: (b, 0, 0)),
        ),
        compiler_params=pltpu.CompilerParams(
            dimension_semantics=("parallel",),
            vmem_limit_bytes=_vmem_limit_bytes(),
        ),
    )(qkv)


# ----------------------------------------------------------------------------
# GPT forward (drop_rate = 0 -> dropout is identity, eval semantics)
# ----------------------------------------------------------------------------
def gpt_forward(params, in_idx, cfg):
    B, S = in_idx.shape
    H = cfg["n_heads"]
    # TODO(synk): embedding gather (data-dependent row lookup) and nn.Dropout
    # (identity at drop_rate=0) are kept in plain JAX, not Pallas.
    tok = jnp.take(params["tok_emb"], in_idx, axis=0)
    x = tok + params["pos_emb"][:S][None, :, :]

    blocks = params["blocks"]
    n_layers = len(blocks)
    # First LN is standalone; every subsequent LN is fused into the preceding
    # residual linear's epilogue (second pallas output).
    h = layer_norm(x, blocks[0]["ln1_scale"], blocks[0]["ln1_shift"])

    for i, blk in enumerate(blocks):
        qkv = linear(h, blk["w_qkv"])                    # fused Wq|Wk|Wv, no bias
        ctx = causal_attention(qkv, H)
        x, h = linear(ctx, blk["w_o"], blk["b_o"], residual=x,
                      ln_scale=blk["ln2_scale"], ln_shift=blk["ln2_shift"])
        ff = linear(h, blk["w_ff1"], blk["b_ff1"], activation="gelu")
        if i + 1 < n_layers:
            nscale, nshift = blocks[i + 1]["ln1_scale"], blocks[i + 1]["ln1_shift"]
        else:
            nscale, nshift = params["lnf_scale"], params["lnf_shift"]
        x, h = linear(ff, blk["w_ff2"], blk["b_ff2"], residual=x,
                      ln_scale=nscale, ln_shift=nshift)

    return linear(h, params["w_head"])                   # out_head, no bias


# ----------------------------------------------------------------------------
# Pure-JAX reference (mirrors the PyTorch module; same bf16-valued weights,
# matmuls in f32 HIGHEST precision).
# ----------------------------------------------------------------------------
def reference_forward(params, in_idx, cfg):
    P = jax.lax.Precision.HIGHEST

    def dot(a, b):
        return jnp.matmul(a.astype(jnp.float32), b.astype(jnp.float32), precision=P)

    def ln(x, g, b):
        m = jnp.mean(x, axis=-1, keepdims=True)
        v = jnp.mean((x - m) ** 2, axis=-1, keepdims=True)
        return g * ((x - m) / jnp.sqrt(v + 1e-5)) + b

    def gelu(x):
        return 0.5 * x * (1.0 + jnp.tanh(jnp.sqrt(2.0 / jnp.pi) * (x + 0.044715 * x ** 3)))

    B, S = in_idx.shape
    D, H = cfg["emb_dim"], cfg["n_heads"]
    Dh = D // H

    x = params["tok_emb"][in_idx] + params["pos_emb"][:S][None]
    for blk in params["blocks"]:
        h = ln(x, blk["ln1_scale"], blk["ln1_shift"])
        qkv = dot(h, blk["w_qkv"])
        q, k, v = jnp.split(qkv, 3, axis=-1)

        def heads(t):
            return t.reshape(B, S, H, Dh).transpose(0, 2, 1, 3)

        qh, kh, vh = heads(q), heads(k), heads(v)
        scores = jnp.matmul(qh, kh.transpose(0, 1, 3, 2), precision=P) / math.sqrt(Dh)
        mask = jnp.triu(jnp.ones((S, S), dtype=bool), k=1)
        scores = jnp.where(mask, -jnp.inf, scores)
        w = jax.nn.softmax(scores, axis=-1)
        ctx = jnp.matmul(w, vh, precision=P).transpose(0, 2, 1, 3).reshape(B, S, D)
        x = dot(ctx, blk["w_o"]) + blk["b_o"] + x

        h = ln(x, blk["ln2_scale"], blk["ln2_shift"])
        h = gelu(dot(h, blk["w_ff1"]) + blk["b_ff1"])
        x = dot(h, blk["w_ff2"]) + blk["b_ff2"] + x

    x = ln(x, params["lnf_scale"], params["lnf_shift"])
    return dot(x, params["w_head"])


# ----------------------------------------------------------------------------
# Deterministic parameter init (matmul weights stored in bf16, rest f32)
# ----------------------------------------------------------------------------
def init_params(cfg, key):
    D, V, C = cfg["emb_dim"], cfg["vocab_size"], cfg["context_length"]
    Dff = 4 * D

    def nrm(k, shape, scale=0.02, dtype=jnp.float32):
        return (scale * jax.random.normal(k, shape)).astype(dtype)

    bf = jnp.bfloat16
    keys = iter(jax.random.split(key, 4 + 8 * cfg["n_layers"]))
    params = {
        "tok_emb": nrm(next(keys), (V, D)),
        "pos_emb": nrm(next(keys), (C, D)),
        "blocks": [],
        "lnf_scale": jnp.ones((D,), jnp.float32),
        "lnf_shift": jnp.zeros((D,), jnp.float32),
        "w_head": nrm(next(keys), (D, V), dtype=bf),
    }
    for _ in range(cfg["n_layers"]):
        params["blocks"].append(
            {
                "ln1_scale": jnp.ones((D,), jnp.float32),
                "ln1_shift": jnp.zeros((D,), jnp.float32),
                "w_qkv": nrm(next(keys), (D, 3 * D), dtype=bf),  # fused Wq|Wk|Wv
                "w_o": nrm(next(keys), (D, D), dtype=bf),
                "b_o": nrm(next(keys), (D,)),
                "ln2_scale": jnp.ones((D,), jnp.float32),
                "ln2_shift": jnp.zeros((D,), jnp.float32),
                "w_ff1": nrm(next(keys), (D, Dff), dtype=bf),
                "b_ff1": nrm(next(keys), (Dff,)),
                "w_ff2": nrm(next(keys), (Dff, D), dtype=bf),
                "b_ff2": nrm(next(keys), (D,)),
            }
        )
    return params


if __name__ == "__main__":
    cfg = dict(
        vocab_size=256,
        context_length=16,
        emb_dim=128,     # multiple of 128 -> lane-dense blocks everywhere
        n_heads=4,
        n_layers=2,
        drop_rate=0.0,   # dropout is identity at rate 0 (eval semantics)
        qkv_bias=False,
    )
    batch, seq = 2, 8

    key = jax.random.PRNGKey(0)
    pkey, ikey = jax.random.split(key)
    params = init_params(cfg, pkey)
    in_idx = jax.random.randint(ikey, (batch, seq), 0, cfg["vocab_size"], dtype=jnp.int32)

    forward = jax.jit(lambda p, idx: gpt_forward(p, idx, cfg))
    logits = jax.block_until_ready(forward(params, in_idx))
    assert logits.shape == (batch, seq, cfg["vocab_size"])

    ref = jax.block_until_ready(reference_forward(params, in_idx, cfg))
    max_err = float(jnp.max(jnp.abs(logits - ref)))
    assert jnp.allclose(logits, ref, atol=2e-2, rtol=2e-2), f"mismatch vs reference: {max_err}"

    print("KERNEL_OK")
</pallas_src>

<mosaic_0001>
module attributes {stable_mosaic.version = 11 : i64} {
  func.func @kernel(%arg0: i32, %arg1: i32, %arg2: i32, %arg3: memref<8x128xf32, #tpu.memory_space<vmem>>, %arg4: memref<128x128xbf16, #tpu.memory_space<vmem>>, %arg5: memref<8x128xf32, #tpu.memory_space<vmem>>, %arg6: memref<8x128xf32, #tpu.memory_space<vmem>>) attributes {dimension_semantics = [#tpu.dimension_semantics<parallel>, #tpu.dimension_semantics<parallel>, #tpu.dimension_semantics<arbitrary>], iteration_bounds = array<i64: 2, 3, 1>, scalar_prefetch = 0 : i64, scratch_operands = 1 : i64, tpu.core_type = #tpu.core_type<tc>, window_params = [{transform_indices = @transform_0, window_bounds = array<i64: 8, 128>}, {transform_indices = @transform_1, window_bounds = array<i64: 128, 128>}, {transform_indices = @transform_2, window_bounds = array<i64: 8, 128>}]} {
    %c0_i32 = arith.constant 0 : i32
    %0 = arith.cmpi eq, %arg2, %c0_i32 : i32
    %1 = arith.extui %0 : i1 to i32
    %c0_i32_0 = arith.constant 0 : i32
    %2 = arith.cmpi ne, %1, %c0_i32_0 : i32
    scf.if %2 {
      %cst_10 = arith.constant 0.000000e+00 : f32
      %13 = vector.broadcast %cst_10 : f32 to vector<8x128xf32>
      %c0_11 = arith.constant 0 : index
      %c0_12 = arith.constant 0 : index
      %14 = vector.load %arg6[%c0_11, %c0_12] : memref<8x128xf32, #tpu.memory_space<vmem>>, vector<8x128xf32>
      tpu.vector_store %arg6[%c0_11, %c0_12], %13 {strides = array<i32>} : memref<8x128xf32, #tpu.memory_space<vmem>>, vector<8x128xf32>,
    } else {
    }
    %c0 = arith.constant 0 : index
    %c0_1 = arith.constant 0 : index
    %3 = vector.load %arg6[%c0, %c0_1] : memref<8x128xf32, #tpu.memory_space<vmem>>, vector<8x128xf32>
    %c0_2 = arith.constant 0 : index
    %c0_3 = arith.constant 0 : index
    %4 = vector.load %arg3[%c0_2, %c0_3] : memref<8x128xf32, #tpu.memory_space<vmem>>, vector<8x128xf32>
    %5 = arith.truncf %4 : vector<8x128xf32> to vector<8x128xbf16>
    %c0_4 = arith.constant 0 : index
    %c0_5 = arith.constant 0 : index
    %6 = vector.load %arg4[%c0_4, %c0_5] : memref<128x128xbf16, #tpu.memory_space<vmem>>, vector<128x128xbf16>
    %cst = arith.constant dense<0.000000e+00> : vector<8x128xf32>
    %7 = tpu.matmul %5, %6, %cst {dimension_numbers = #tpu.dot_dimension_numbers<[1], [0], [0], [1], [0, 0, 1, 1], [], []>} : vector<8x128xbf16>, vector<128x128xbf16>, vector<8x128xf32> -> vector<8x128xf32>
    %8 = arith.addf %3, %7 : vector<8x128xf32>
    %c0_6 = arith.constant 0 : index
    %c0_7 = arith.constant 0 : index
    %9 = vector.load %arg6[%c0_6, %c0_7] : memref<8x128xf32, #tpu.memory_space<vmem>>, vector<8x128xf32>
    tpu.vector_store %arg6[%c0_6, %c0_7], %8 {strides = array<i32>} : memref<8x128xf32, #tpu.memory_space<vmem>>, vector<8x128xf32>,
    %c0_i32_8 = arith.constant 0 : i32
    %10 = arith.cmpi eq, %arg2, %c0_i32_8 : i32
    %11 = arith.extui %10 : i1 to i32
    %c0_i32_9 = arith.constant 0 : i32
    %12 = arith.cmpi ne, %11, %c0_i32_9 : i32
    scf.if %12 {
      %c0_10 = arith.constant 0 : index
      %c0_11 = arith.constant 0 : index
      %13 = vector.load %arg6[%c0_10, %c0_11] : memref<8x128xf32, #tpu.memory_space<vmem>>, vector<8x128xf32>
      %c0_12 = arith.constant 0 : index
      %c0_13 = arith.constant 0 : index
      %14 = vector.load %arg5[%c0_12, %c0_13] : memref<8x128xf32, #tpu.memory_space<vmem>>, vector<8x128xf32>
      tpu.vector_store %arg5[%c0_12, %c0_13], %13 {strides = array<i32>} : memref<8x128xf32, #tpu.memory_space<vmem>>, vector<8x128xf32>,
    } else {
    }
    return
  }
  func.func @transform_0(%arg0: i32, %arg1: i32, %arg2: i32) -> (i32, i32) {
    %c0_i32 = arith.constant 0 : i32
    return %arg0, %arg2 : i32, i32
  }
  func.func @transform_1(%arg0: i32, %arg1: i32, %arg2: i32) -> (i32, i32) {
    %c0_i32 = arith.constant 0 : i32
    return %arg2, %arg1 : i32, i32
  }
  func.func @transform_2(%arg0: i32, %arg1: i32, %arg2: i32) -> (i32, i32) {
    %c0_i32 = arith.constant 0 : i32
    return %arg0, %arg1 : i32, i32
  }
}

module attributes {stable_mosaic.version = 11 : i64} {
  func.func @kernel(%arg0: i32, %arg1: i32, %arg2: i32, %arg3: memref<8x128xf32, #tpu.memory_space<vmem>>, %arg4: memref<128x128xbf16, #tpu.memory_space<vmem>>, %arg5: memref<1x128xf32, #tpu.memory_space<vmem>>, %arg6: memref<8x128xf32, #tpu.memory_space<vmem>>, %arg7: memref<1x128xf32, #tpu.memory_space<vmem>>, %arg8: memref<1x128xf32, #tpu.memory_space<vmem>>, %arg9: memref<8x128xf32, #tpu.memory_space<vmem>>, %arg10: memref<8x128xf32, #tpu.memory_space<vmem>>, %arg11: memref<8x128xf32, #tpu.memory_space<vmem>>) attributes {dimension_semantics = [#tpu.dimension_semantics<parallel>, #tpu.dimension_semantics<parallel>, #tpu.dimension_semantics<arbitrary>], iteration_bounds = array<i64: 2, 1, 1>, scalar_prefetch = 0 : i64, scratch_operands = 1 : i64, tpu.core_type = #tpu.core_type<tc>, window_params = [{transform_indices = @transform_0, window_bounds = array<i64: 8, 128>}, {transform_indices = @transform_1, window_bounds = array<i64: 128, 128>}, {transform_indices = @transform_2, window_bounds = array<i64: 1, 128>}, {transform_indices = @transform_3, window_bounds = array<i64: 8, 128>}, {transform_indices = @transform_4, window_bounds = array<i64: 1, 128>}, {transform_indices = @transform_5, window_bounds = array<i64: 1, 128>}, {transform_indices = @transform_6, window_bounds = array<i64: 8, 128>}, {transform_indices = @transform_7, window_bounds = array<i64: 8, 128>}]} {
    %c0_i32 = arith.constant 0 : i32
    %0 = arith.cmpi eq, %arg2, %c0_i32 : i32
    %1 = arith.extui %0 : i1 to i32
    %c0_i32_0 = arith.constant 0 : i32
    %2 = arith.cmpi ne, %1, %c0_i32_0 : i32
    scf.if %2 {
      %cst_10 = arith.constant 0.000000e+00 : f32
      %13 = vector.broadcast %cst_10 : f32 to vector<8x128xf32>
      %c0_11 = arith.constant 0 : index
      %c0_12 = arith.constant 0 : index
      %14 = vector.load %arg11[%c0_11, %c0_12] : memref<8x128xf32, #tpu.memory_space<vmem>>, vector<8x128xf32>
      tpu.vector_store %arg11[%c0_11, %c0_12], %13 {strides = array<i32>} : memref<8x128xf32, #tpu.memory_space<vmem>>, vector<8x128xf32>,
    } else {
    }
    %c0 = arith.constant 0 : index
    %c0_1 = arith.constant 0 : index
    %3 = vector.load %arg11[%c0, %c0_1] : memref<8x128xf32, #tpu.memory_space<vmem>>, vector<8x128xf32>
    %c0_2 = arith.constant 0 : index
    %c0_3 = arith.constant 0 : index
    %4 = vector.load %arg3[%c0_2, %c0_3] : memref<8x128xf32, #tpu.memory_space<vmem>>, vector<8x128xf32>
    %5 = arith.truncf %4 : vector<8x128xf32> to vector<8x128xbf16>
    %c0_4 = arith.constant 0 : index
    %c0_5 = arith.constant 0 : index
    %6 = vector.load %arg4[%c0_4, %c0_5] : memref<128x128xbf16, #tpu.memory_space<vmem>>, vector<128x128xbf16>
    %cst = arith.constant dense<0.000000e+00> : vector<8x128xf32>
    %7 = tpu.matmul %5, %6, %cst {dimension_numbers = #tpu.dot_dimension_numbers<[1], [0], [0], [1], [0, 0, 1, 1], [], []>} : vector<8x128xbf16>, vector<128x128xbf16>, vector<8x128xf32> -> vector<8x128xf32>
    %8 = arith.addf %3, %7 : vector<8x128xf32>
    %c0_6 = arith.constant 0 : index
    %c0_7 = arith.constant 0 : index
    %9 = vector.load %arg11[%c0_6, %c0_7] : memref<8x128xf32, #tpu.memory_space<vmem>>, vector<8x128xf32>
    tpu.vector_store %arg11[%c0_6, %c0_7], %8 {strides = array<i32>} : memref<8x128xf32, #tpu.memory_space<vmem>>, vector<8x128xf32>,
    %c0_i32_8 = arith.constant 0 : i32
    %10 = arith.cmpi eq, %arg2, %c0_i32_8 : i32
    %11 = arith.extui %10 : i1 to i32
    %c0_i32_9 = arith.constant 0 : i32
    %12 = arith.cmpi ne, %11, %c0_i32_9 : i32
    scf.if %12 {
      %c0_10 = arith.constant 0 : index
      %c0_11 = arith.constant 0 : index
      %13 = vector.load %arg11[%c0_10, %c0_11] : memref<8x128xf32, #tpu.memory_space<vmem>>, vector<8x128xf32>
      %c0_12 = arith.constant 0 : index
      %c0_13 = arith.constant 0 : index
      %14 = vector.load %arg5[%c0_12, %c0_13] : memref<1x128xf32, #tpu.memory_space<vmem>>, vector<1x128xf32>
      %15 = vector.broadcast %14 : vector<1x128xf32> to vector<8x128xf32>
      %16 = arith.addf %13, %15 : vector<8x128xf32>
      %c0_14 = arith.constant 0 : index
      %c0_15 = arith.constant 0 : index
      %17 = vector.load %arg6[%c0_14, %c0_15] : memref<8x128xf32, #tpu.memory_space<vmem>>, vector<8x128xf32>
      %18 = arith.addf %16, %17 : vector<8x128xf32>
      %c0_16 = arith.constant 0 : index
      %c0_17 = arith.constant 0 : index
      %19 = vector.load %arg9[%c0_16, %c0_17] : memref<8x128xf32, #tpu.memory_space<vmem>>, vector<8x128xf32>
      tpu.vector_store %arg9[%c0_16, %c0_17], %18 {strides = array<i32>} : memref<8x128xf32, #tpu.memory_space<vmem>>, vector<8x128xf32>,
      %cst_18 = arith.constant dense<0.000000e+00> : vector<8xf32>
      %20 = vector.multi_reduction <add>, %18, %cst_18 [1] : vector<8x128xf32> to vector<8xf32>
      %21 = vector.shape_cast %20 : vector<8xf32> to vector<8x1xf32>
      %cst_19 = arith.constant 7.812500e-03 : f32
      %22 = vector.broadcast %cst_19 : f32 to vector<8x1xf32>
      %23 = arith.mulf %21, %22 : vector<8x1xf32>
      %24 = vector.broadcast %23 : vector<8x1xf32> to vector<8x128xf32>
      %25 = arith.subf %18, %24 : vector<8x128xf32>
      %26 = arith.mulf %25, %25 : vector<8x128xf32>
      %cst_20 = arith.constant dense<0.000000e+00> : vector<8xf32>
      %27 = vector.multi_reduction <add>, %26, %cst_20 [1] : vector<8x128xf32> to vector<8xf32>
      %28 = vector.shape_cast %27 : vector<8xf32> to vector<8x1xf32>
      %cst_21 = arith.constant 7.812500e-03 : f32
      %29 = vector.broadcast %cst_21 : f32 to vector<8x1xf32>
      %30 = arith.mulf %28, %29 : vector<8x1xf32>
      %cst_22 = arith.constant 9.99999974E-6 : f32
      %31 = vector.broadcast %cst_22 : f32 to vector<8x1xf32>
      %32 = arith.addf %30, %31 : vector<8x1xf32>
      %33 = math.rsqrt %32 : vector<8x1xf32>
      %34 = vector.broadcast %33 : vector<8x1xf32> to vector<8x128xf32>
      %35 = arith.mulf %25, %34 : vector<8x128xf32>
      %c0_23 = arith.constant 0 : index
      %c0_24 = arith.constant 0 : index
      %36 = vector.load %arg7[%c0_23, %c0_24] : memref<1x128xf32, #tpu.memory_space<vmem>>, vector<1x128xf32>
      %37 = vector.broadcast %36 : vector<1x128xf32> to vector<8x128xf32>
      %38 = arith.mulf %35, %37 : vector<8x128xf32>
      %c0_25 = arith.constant 0 : index
      %c0_26 = arith.constant 0 : index
      %39 = vector.load %arg8[%c0_25, %c0_26] : memref<1x128xf32, #tpu.memory_space<vmem>>, vector<1x128xf32>
      %40 = vector.broadcast %39 : vector<1x128xf32> to vector<8x128xf32>
      %41 = arith.addf %38, %40 : vector<8x128xf32>
      %c0_27 = arith.constant 0 : index
      %c0_28 = arith.constant 0 : index
      %42 = vector.load %arg10[%c0_27, %c0_28] : memref<8x128xf32, #tpu.memory_space<vmem>>, vector<8x128xf32>
      tpu.vector_store %arg10[%c0_27, %c0_28], %41 {strides = array<i32>} : memref<8x128xf32, #tpu.memory_space<vmem>>, vector<8x128xf32>,
    } else {
    }
    return
  }
  func.func @transform_0(%arg0: i32, %arg1: i32, %arg2: i32) -> (i32, i32) {
    %c0_i32 = arith.constant 0 : i32
    return %arg0, %arg2 : i32, i32
  }
  func.func @transform_1(%arg0: i32, %arg1: i32, %arg2: i32) -> (i32, i32) {
    %c0_i32 = arith.constant 0 : i32
    return %arg2, %arg1 : i32, i32
  }
  func.func @transform_2(%arg0: i32, %arg1: i32, %arg2: i32) -> (i32, i32) {
    %c0_i32 = arith.constant 0 : i32
    %c0_i32_0 = arith.constant 0 : i32
    return %c0_i32, %arg1 : i32, i32
  }
  func.func @transform_3(%arg0: i32, %arg1: i32, %arg2: i32) -> (i32, i32) {
    %c0_i32 = arith.constant 0 : i32
    return %arg0, %arg1 : i32, i32
  }
  func.func @transform_4(%arg0: i32, %arg1: i32, %arg2: i32) -> (i32, i32) {
    %c0_i32 = arith.constant 0 : i32
    %c0_i32_0 = arith.constant 0 : i32
    return %c0_i32, %arg1 : i32, i32
  }
  func.func @transform_5(%arg0: i32, %arg1: i32, %arg2: i32) -> (i32, i32) {
    %c0_i32 = arith.constant 0 : i32
    %c0_i32_0 = arith.constant 0 : i32
    return %c0_i32, %arg1 : i32, i32
  }
  func.func @transform_6(%arg0: i32, %arg1: i32, %arg2: i32) -> (i32, i32) {
    %c0_i32 = arith.constant 0 : i32
    return %arg0, %arg1 : i32, i32
  }
  func.func @transform_7(%arg0: i32, %arg1: i32, %arg2: i32) -> (i32, i32) {
    %c0_i32 = arith.constant 0 : i32
    return %arg0, %arg1 : i32, i32
  }
}

module attributes {stable_mosaic.version = 11 : i64} {
  func.func @_layernorm_kernel(%arg0: i32, %arg1: memref<16x128xf32, #tpu.memory_space<vmem>>, %arg2: memref<1x128xf32, #tpu.memory_space<vmem>>, %arg3: memref<1x128xf32, #tpu.memory_space<vmem>>, %arg4: memref<16x128xf32, #tpu.memory_space<vmem>>) attributes {dimension_semantics = [#tpu.dimension_semantics<parallel>], iteration_bounds = array<i64: 1>, scalar_prefetch = 0 : i64, scratch_operands = 0 : i64, tpu.core_type = #tpu.core_type<tc>, window_params = [{transform_indices = @transform_0, window_bounds = array<i64: 16, 128>}, {pipeline_mode = #tpu.pipeline_mode<synchronous>, transform_indices = @transform_1, window_bounds = array<i64: 1, 128>}, {pipeline_mode = #tpu.pipeline_mode<synchronous>, transform_indices = @transform_2, window_bounds = array<i64: 1, 128>}, {transform_indices = @transform_3, window_bounds = array<i64: 16, 128>}]} {
    %c0 = arith.constant 0 : index
    %c0_0 = arith.constant 0 : index
    %0 = vector.load %arg1[%c0, %c0_0] : memref<16x128xf32, #tpu.memory_space<vmem>>, vector<16x128xf32>
    %cst = arith.constant dense<0.000000e+00> : vector<16xf32>
    %1 = vector.multi_reduction <add>, %0, %cst [1] : vector<16x128xf32> to vector<16xf32>
    %2 = vector.shape_cast %1 : vector<16xf32> to vector<16x1xf32>
    %cst_1 = arith.constant 7.812500e-03 : f32
    %3 = vector.broadcast %cst_1 : f32 to vector<16x1xf32>
    %4 = arith.mulf %2, %3 : vector<16x1xf32>
    %5 = vector.broadcast %4 : vector<16x1xf32> to vector<16x128xf32>
    %6 = arith.subf %0, %5 : vector<16x128xf32>
    %7 = arith.mulf %6, %6 : vector<16x128xf32>
    %cst_2 = arith.constant dense<0.000000e+00> : vector<16xf32>
    %8 = vector.multi_reduction <add>, %7, %cst_2 [1] : vector<16x128xf32> to vector<16xf32>
    %9 = vector.shape_cast %8 : vector<16xf32> to vector<16x1xf32>
    %cst_3 = arith.constant 7.812500e-03 : f32
    %10 = vector.broadcast %cst_3 : f32 to vector<16x1xf32>
    %11 = arith.mulf %9, %10 : vector<16x1xf32>
    %cst_4 = arith.constant 9.99999974E-6 : f32
    %12 = vector.broadcast %cst_4 : f32 to vector<16x1xf32>
    %13 = arith.addf %11, %12 : vector<16x1xf32>
    %14 = math.rsqrt %13 : vector<16x1xf32>
    %15 = vector.broadcast %14 : vector<16x1xf32> to vector<16x128xf32>
    %16 = arith.mulf %6, %15 : vector<16x128xf32>
    %c0_5 = arith.constant 0 : index
    %c0_6 = arith.constant 0 : index
    %17 = vector.load %arg2[%c0_5, %c0_6] : memref<1x128xf32, #tpu.memory_space<vmem>>, vector<1x128xf32>
    %18 = vector.broadcast %17 : vector<1x128xf32> to vector<16x128xf32>
    %19 = arith.mulf %16, %18 : vector<16x128xf32>
    %c0_7 = arith.constant 0 : index
    %c0_8 = arith.constant 0 : index
    %20 = vector.load %arg3[%c0_7, %c0_8] : memref<1x128xf32, #tpu.memory_space<vmem>>, vector<1x128xf32>
    %21 = vector.broadcast %20 : vector<1x128xf32> to vector<16x128xf32>
    %22 = arith.addf %19, %21 : vector<16x128xf32>
    %c0_9 = arith.constant 0 : index
    %c0_10 = arith.constant 0 : index
    %23 = vector.load %arg4[%c0_9, %c0_10] : memref<16x128xf32, #tpu.memory_space<vmem>>, vector<16x128xf32>
    tpu.vector_store %arg4[%c0_9, %c0_10], %22 {strides = array<i32>} : memref<16x128xf32, #tpu.memory_space<vmem>>, vector<16x128xf32>,
    return
  }
  func.func @transform_0(%arg0: i32) -> (i32, i32) {
    %c0_i32 = arith.constant 0 : i32
    %c0_i32_0 = arith.constant 0 : i32
    return %arg0, %c0_i32 : i32, i32
  }
  func.func @transform_1(%arg0: i32) -> (i32, i32) {
    %c0_i32 = arith.constant 0 : i32
    %c0_i32_0 = arith.constant 0 : i32
    %c0_i32_1 = arith.constant 0 : i32
    return %c0_i32, %c0_i32_0 : i32, i32
  }
  func.func @transform_2(%arg0: i32) -> (i32, i32) {
    %c0_i32 = arith.constant 0 : i32
    %c0_i32_0 = arith.constant 0 : i32
    %c0_i32_1 = arith.constant 0 : i32
    return %c0_i32, %c0_i32_0 : i32, i32
  }
  func.func @transform_3(%arg0: i32) -> (i32, i32) {
    %c0_i32 = arith.constant 0 : i32
    %c0_i32_0 = arith.constant 0 : i32
    return %arg0, %c0_i32 : i32, i32
  }
}

module attributes {stable_mosaic.version = 11 : i64} {
  func.func @kernel(%arg0: i32, %arg1: memref<1x8x384xf32, #tpu.memory_space<vmem>>, %arg2: memref<1x8x128xf32, #tpu.memory_space<vmem>>) attributes {dimension_semantics = [#tpu.dimension_semantics<parallel>], iteration_bounds = array<i64: 2>, scalar_prefetch = 0 : i64, scratch_operands = 0 : i64, tpu.core_type = #tpu.core_type<tc>, window_params = [{transform_indices = @transform_0, window_bounds = array<i64: 1, 8, 384>}, {transform_indices = @transform_1, window_bounds = array<i64: 1, 8, 128>}]} {
    %c0 = arith.constant 0 : index
    %c0_0 = arith.constant 0 : index
    %c0_1 = arith.constant 0 : index
    %0 = vector.load %arg1[%c0, %c0_0, %c0_1] : memref<1x8x384xf32, #tpu.memory_space<vmem>>, vector<1x8x384xf32>
    %1 = vector.shape_cast %0 : vector<1x8x384xf32> to vector<8x384xf32>
    %2 = tpu.iota {dimensions = array<i32: 0>} : vector<8x8xi32>
    %3 = tpu.iota {dimensions = array<i32: 1>} : vector<8x8xi32>
    %4 = arith.cmpi sle, %3, %2 : vector<8x8xi32>
    %5 = vector.extract_strided_slice %1 {offsets = [0, 0], sizes = [8, 32], strides = [1, 1]} : vector<8x384xf32> to vector<8x32xf32>
    %cst = arith.constant 0.176776692 : f32
    %6 = vector.broadcast %cst : f32 to vector<8x32xf32>
    %7 = arith.mulf %5, %6 : vector<8x32xf32>
    %8 = arith.truncf %7 : vector<8x32xf32> to vector<8x32xbf16>
    %9 = vector.extract_strided_slice %1 {offsets = [0, 128], sizes = [8, 32], strides = [1, 1]} : vector<8x384xf32> to vector<8x32xf32>
    %10 = arith.truncf %9 : vector<8x32xf32> to vector<8x32xbf16>
    %11 = vector.extract_strided_slice %1 {offsets = [0, 256], sizes = [8, 32], strides = [1, 1]} : vector<8x384xf32> to vector<8x32xf32>
    %12 = arith.truncf %11 : vector<8x32xf32> to vector<8x32xbf16>
    %cst_2 = arith.constant dense<0.000000e+00> : vector<8x8xf32>
    %13 = tpu.matmul %8, %10, %cst_2 {dimension_numbers = #tpu.dot_dimension_numbers<[1], [1], [0], [0], [0, 0, 1, 0], [], []>} : vector<8x32xbf16>, vector<8x32xbf16>, vector<8x8xf32> -> vector<8x8xf32>
    %cst_3 = arith.constant -1.000000e+30 : f32
    %14 = vector.broadcast %cst_3 : f32 to vector<8x8xf32>
    %15 = arith.select %4, %13, %14 : vector<8x8xi1>, vector<8x8xf32>
    %cst_4 = arith.constant dense<0xFF800000> : vector<8xf32>
    %16 = vector.multi_reduction <maximumf>, %15, %cst_4 [1] : vector<8x8xf32> to vector<8xf32>
    %17 = vector.shape_cast %16 : vector<8xf32> to vector<8x1xf32>
    %18 = vector.broadcast %17 : vector<8x1xf32> to vector<8x8xf32>
    %19 = arith.subf %15, %18 : vector<8x8xf32>
    %20 = math.exp %19 : vector<8x8xf32>
    %cst_5 = arith.constant dense<0.000000e+00> : vector<8xf32>
    %21 = vector.multi_reduction <add>, %20, %cst_5 [1] : vector<8x8xf32> to vector<8xf32>
    %22 = vector.shape_cast %21 : vector<8xf32> to vector<8x1xf32>
    %23 = tpu.reciprocal %22 {approx = true} : vector<8x1xf32> -> vector<8x1xf32>
    %24 = vector.broadcast %23 : vector<8x1xf32> to vector<8x8xf32>
    %25 = arith.mulf %20, %24 : vector<8x8xf32>
    %26 = arith.truncf %25 : vector<8x8xf32> to vector<8x8xbf16>
    %cst_6 = arith.constant dense<0.000000e+00> : vector<8x32xf32>
    %27 = tpu.matmul %26, %12, %cst_6 {dimension_numbers = #tpu.dot_dimension_numbers<[1], [0], [0], [1], [0, 0, 1, 1], [], []>} : vector<8x8xbf16>, vector<8x32xbf16>, vector<8x32xf32> -> vector<8x32xf32>
    %28 = vector.extract_strided_slice %1 {offsets = [0, 32], sizes = [8, 32], strides = [1, 1]} : vector<8x384xf32> to vector<8x32xf32>
    %cst_7 = arith.constant 0.176776692 : f32
    %29 = vector.broadcast %cst_7 : f32 to vector<8x32xf32>
    %30 = arith.mulf %28, %29 : vector<8x32xf32>
    %31 = arith.truncf %30 : vector<8x32xf32> to vector<8x32xbf16>
    %32 = vector.extract_strided_slice %1 {offsets = [0, 160], sizes = [8, 32], strides = [1, 1]} : vector<8x384xf32> to vector<8x32xf32>
    %33 = arith.truncf %32 : vector<8x32xf32> to vector<8x32xbf16>
    %34 = vector.extract_strided_slice %1 {offsets = [0, 288], sizes = [8, 32], strides = [1, 1]} : vector<8x384xf32> to vector<8x32xf32>
    %35 = arith.truncf %34 : vector<8x32xf32> to vector<8x32xbf16>
    %cst_8 = arith.constant dense<0.000000e+00> : vector<8x8xf32>
    %36 = tpu.matmul %31, %33, %cst_8 {dimension_numbers = #tpu.dot_dimension_numbers<[1], [1], [0], [0], [0, 0, 1, 0], [], []>} : vector<8x32xbf16>, vector<8x32xbf16>, vector<8x8xf32> -> vector<8x8xf32>
    %cst_9 = arith.constant -1.000000e+30 : f32
    %37 = vector.broadcast %cst_9 : f32 to vector<8x8xf32>
    %38 = arith.select %4, %36, %37 : vector<8x8xi1>, vector<8x8xf32>
    %cst_10 = arith.constant dense<0xFF800000> : vector<8xf32>
    %39 = vector.multi_reduction <maximumf>, %38, %cst_10 [1] : vector<8x8xf32> to vector<8xf32>
    %40 = vector.shape_cast %39 : vector<8xf32> to vector<8x1xf32>
    %41 = vector.broadcast %40 : vector<8x1xf32> to vector<8x8xf32>
    %42 = arith.subf %38, %41 : vector<8x8xf32>
    %43 = math.exp %42 : vector<8x8xf32>
    %cst_11 = arith.constant dense<0.000000e+00> : vector<8xf32>
    %44 = vector.multi_reduction <add>, %43, %cst_11 [1] : vector<8x8xf32> to vector<8xf32>
    %45 = vector.shape_cast %44 : vector<8xf32> to vector<8x1xf32>
    %46 = tpu.reciprocal %45 {approx = true} : vector<8x1xf32> -> vector<8x1xf32>
    %47 = vector.broadcast %46 : vector<8x1xf32> to vector<8x8xf32>
    %48 = arith.mulf %43, %47 : vector<8x8xf32>
    %49 = arith.truncf %48 : vector<8x8xf32> to vector<8x8xbf16>
    %cst_12 = arith.constant dense<0.000000e+00> : vector<8x32xf32>
    %50 = tpu.matmul %49, %35, %cst_12 {dimension_numbers = #tpu.dot_dimension_numbers<[1], [0], [0], [1], [0, 0, 1, 1], [], []>} : vector<8x8xbf16>, vector<8x32xbf16>, vector<8x32xf32> -> vector<8x32xf32>
    %51 = vector.extract_strided_slice %1 {offsets = [0, 64], sizes = [8, 32], strides = [1, 1]} : vector<8x384xf32> to vector<8x32xf32>
    %cst_13 = arith.constant 0.176776692 : f32
    %52 = vector.broadcast %cst_13 : f32 to vector<8x32xf32>
    %53 = arith.mulf %51, %52 : vector<8x32xf32>
    %54 = arith.truncf %53 : vector<8x32xf32> to vector<8x32xbf16>
    %55 = vector.extract_strided_slice %1 {offsets = [0, 192], sizes = [8, 32], strides = [1, 1]} : vector<8x384xf32> to vector<8x32xf32>
    %56 = arith.truncf %55 : vector<8x32xf32> to vector<8x32xbf16>
    %57 = vector.extract_strided_slice %1 {offsets = [0, 320], sizes = [8, 32], strides = [1, 1]} : vector<8x384xf32> to vector<8x32xf32>
    %58 = arith.truncf %57 : vector<8x32xf32> to vector<8x32xbf16>
    %cst_14 = arith.constant dense<0.000000e+00> : vector<8x8xf32>
    %59 = tpu.matmul %54, %56, %cst_14 {dimension_numbers = #tpu.dot_dimension_numbers<[1], [1], [0], [0], [0, 0, 1, 0], [], []>} : vector<8x32xbf16>, vector<8x32xbf16>, vector<8x8xf32> -> vector<8x8xf32>
    %cst_15 = arith.constant -1.000000e+30 : f32
    %60 = vector.broadcast %cst_15 : f32 to vector<8x8xf32>
    %61 = arith.select %4, %59, %60 : vector<8x8xi1>, vector<8x8xf32>
    %cst_16 = arith.constant dense<0xFF800000> : vector<8xf32>
    %62 = vector.multi_reduction <maximumf>, %61, %cst_16 [1] : vector<8x8xf32> to vector<8xf32>
    %63 = vector.shape_cast %62 : vector<8xf32> to vector<8x1xf32>
    %64 = vector.broadcast %63 : vector<8x1xf32> to vector<8x8xf32>
    %65 = arith.subf %61, %64 : vector<8x8xf32>
    %66 = math.exp %65 : vector<8x8xf32>
    %cst_17 = arith.constant dense<0.000000e+00> : vector<8xf32>
    %67 = vector.multi_reduction <add>, %66, %cst_17 [1] : vector<8x8xf32> to vector<8xf32>
    %68 = vector.shape_cast %67 : vector<8xf32> to vector<8x1xf32>
    %69 = tpu.reciprocal %68 {approx = true} : vector<8x1xf32> -> vector<8x1xf32>
    %70 = vector.broadcast %69 : vector<8x1xf32> to vector<8x8xf32>
    %71 = arith.mulf %66, %70 : vector<8x8xf32>
    %72 = arith.truncf %71 : vector<8x8xf32> to vector<8x8xbf16>
    %cst_18 = arith.constant dense<0.000000e+00> : vector<8x32xf32>
    %73 = tpu.matmul %72, %58, %cst_18 {dimension_numbers = #tpu.dot_dimension_numbers<[1], [0], [0], [1], [0, 0, 1, 1], [], []>} : vector<8x8xbf16>, vector<8x32xbf16>, vector<8x32xf32> -> vector<8x32xf32>
    %74 = vector.extract_strided_slice %1 {offsets = [0, 96], sizes = [8, 32], strides = [1, 1]} : vector<8x384xf32> to vector<8x32xf32>
    %cst_19 = arith.constant 0.176776692 : f32
    %75 = vector.broadcast %cst_19 : f32 to vector<8x32xf32>
    %76 = arith.mulf %74, %75 : vector<8x32xf32>
    %77 = arith.truncf %76 : vector<8x32xf32> to vector<8x32xbf16>
    %78 = vector.extract_strided_slice %1 {offsets = [0, 224], sizes = [8, 32], strides = [1, 1]} : vector<8x384xf32> to vector<8x32xf32>
    %79 = arith.truncf %78 : vector<8x32xf32> to vector<8x32xbf16>
    %80 = vector.extract_strided_slice %1 {offsets = [0, 352], sizes = [8, 32], strides = [1, 1]} : vector<8x384xf32> to vector<8x32xf32>
    %81 = arith.truncf %80 : vector<8x32xf32> to vector<8x32xbf16>
    %cst_20 = arith.constant dense<0.000000e+00> : vector<8x8xf32>
    %82 = tpu.matmul %77, %79, %cst_20 {dimension_numbers = #tpu.dot_dimension_numbers<[1], [1], [0], [0], [0, 0, 1, 0], [], []>} : vector<8x32xbf16>, vector<8x32xbf16>, vector<8x8xf32> -> vector<8x8xf32>
    %cst_21 = arith.constant -1.000000e+30 : f32
    %83 = vector.broadcast %cst_21 : f32 to vector<8x8xf32>
    %84 = arith.select %4, %82, %83 : vector<8x8xi1>, vector<8x8xf32>
    %cst_22 = arith.constant dense<0xFF800000> : vector<8xf32>
    %85 = vector.multi_reduction <maximumf>, %84, %cst_22 [1] : vector<8x8xf32> to vector<8xf32>
    %86 = vector.shape_cast %85 : vector<8xf32> to vector<8x1xf32>
    %87 = vector.broadcast %86 : vector<8x1xf32> to vector<8x8xf32>
    %88 = arith.subf %84, %87 : vector<8x8xf32>
    %89 = math.exp %88 : vector<8x8xf32>
    %cst_23 = arith.constant dense<0.000000e+00> : vector<8xf32>
    %90 = vector.multi_reduction <add>, %89, %cst_23 [1] : vector<8x8xf32> to vector<8xf32>
    %91 = vector.shape_cast %90 : vector<8xf32> to vector<8x1xf32>
    %92 = tpu.reciprocal %91 {approx = true} : vector<8x1xf32> -> vector<8x1xf32>
    %93 = vector.broadcast %92 : vector<8x1xf32> to vector<8x8xf32>
    %94 = arith.mulf %89, %93 : vector<8x8xf32>
    %95 = arith.truncf %94 : vector<8x8xf32> to vector<8x8xbf16>
    %cst_24 = arith.constant dense<0.000000e+00> : vector<8x32xf32>
    %96 = tpu.matmul %95, %81, %cst_24 {dimension_numbers = #tpu.dot_dimension_numbers<[1], [0], [0], [1], [0, 0, 1, 1], [], []>} : vector<8x8xbf16>, vector<8x32xbf16>, vector<8x32xf32> -> vector<8x32xf32>
    %97 = tpu.concatenate %27, %50, %73, %96 in 1 : vector<8x32xf32>, vector<8x32xf32>, vector<8x32xf32>, vector<8x32xf32> -> vector<8x128xf32>
    %c0_25 = arith.constant 0 : index
    %c0_26 = arith.constant 0 : index
    %c0_27 = arith.constant 0 : index
    %98 = vector.load %arg2[%c0_25, %c0_26, %c0_27] : memref<1x8x128xf32, #tpu.memory_space<vmem>>, vector<1x8x128xf32>
    %99 = vector.shape_cast %98 : vector<1x8x128xf32> to vector<8x128xf32>
    %100 = vector.shape_cast %97 : vector<8x128xf32> to vector<1x8x128xf32>
    tpu.vector_store %arg2[%c0_25, %c0_26, %c0_27], %100 {strides = array<i32>} : memref<1x8x128xf32, #tpu.memory_space<vmem>>, vector<1x8x128xf32>,
    return
  }
  func.func @transform_0(%arg0: i32) -> (i32, i32, i32) {
    %c0_i32 = arith.constant 0 : i32
    %c0_i32_0 = arith.constant 0 : i32
    %c0_i32_1 = arith.constant 0 : i32
    return %arg0, %c0_i32, %c0_i32_0 : i32, i32, i32
  }
  func.func @transform_1(%arg0: i32) -> (i32, i32, i32) {
    %c0_i32 = arith.constant 0 : i32
    %c0_i32_0 = arith.constant 0 : i32
    %c0_i32_1 = arith.constant 0 : i32
    return %arg0, %c0_i32, %c0_i32_0 : i32, i32, i32
  }
}

module attributes {stable_mosaic.version = 11 : i64} {
  func.func @kernel(%arg0: i32, %arg1: i32, %arg2: i32, %arg3: memref<8x512xf32, #tpu.memory_space<vmem>>, %arg4: memref<512x128xbf16, #tpu.memory_space<vmem>>, %arg5: memref<1x128xf32, #tpu.memory_space<vmem>>, %arg6: memref<8x128xf32, #tpu.memory_space<vmem>>, %arg7: memref<1x128xf32, #tpu.memory_space<vmem>>, %arg8: memref<1x128xf32, #tpu.memory_space<vmem>>, %arg9: memref<8x128xf32, #tpu.memory_space<vmem>>, %arg10: memref<8x128xf32, #tpu.memory_space<vmem>>, %arg11: memref<8x128xf32, #tpu.memory_space<vmem>>) attributes {dimension_semantics = [#tpu.dimension_semantics<parallel>, #tpu.dimension_semantics<parallel>, #tpu.dimension_semantics<arbitrary>], iteration_bounds = array<i64: 2, 1, 1>, scalar_prefetch = 0 : i64, scratch_operands = 1 : i64, tpu.core_type = #tpu.core_type<tc>, window_params = [{transform_indices = @transform_0, window_bounds = array<i64: 8, 512>}, {transform_indices = @transform_1, window_bounds = array<i64: 512, 128>}, {transform_indices = @transform_2, window_bounds = array<i64: 1, 128>}, {transform_indices = @transform_3, window_bounds = array<i64: 8, 128>}, {transform_indices = @transform_4, window_bounds = array<i64: 1, 128>}, {transform_indices = @transform_5, window_bounds = array<i64: 1, 128>}, {transform_indices = @transform_6, window_bounds = array<i64: 8, 128>}, {transform_indices = @transform_7, window_bounds = array<i64: 8, 128>}]} {
    %c0_i32 = arith.constant 0 : i32
    %0 = arith.cmpi eq, %arg2, %c0_i32 : i32
    %1 = arith.extui %0 : i1 to i32
    %c0_i32_0 = arith.constant 0 : i32
    %2 = arith.cmpi ne, %1, %c0_i32_0 : i32
    scf.if %2 {
      %cst_10 = arith.constant 0.000000e+00 : f32
      %13 = vector.broadcast %cst_10 : f32 to vector<8x128xf32>
      %c0_11 = arith.constant 0 : index
      %c0_12 = arith.constant 0 : index
      %14 = vector.load %arg11[%c0_11, %c0_12] : memref<8x128xf32, #tpu.memory_space<vmem>>, vector<8x128xf32>
      tpu.vector_store %arg11[%c0_11, %c0_12], %13 {strides = array<i32>} : memref<8x128xf32, #tpu.memory_space<vmem>>, vector<8x128xf32>,
    } else {
    }
    %c0 = arith.constant 0 : index
    %c0_1 = arith.constant 0 : index
    %3 = vector.load %arg11[%c0, %c0_1] : memref<8x128xf32, #tpu.memory_space<vmem>>, vector<8x128xf32>
    %c0_2 = arith.constant 0 : index
    %c0_3 = arith.constant 0 : index
    %4 = vector.load %arg3[%c0_2, %c0_3] : memref<8x512xf32, #tpu.memory_space<vmem>>, vector<8x512xf32>
    %5 = arith.truncf %4 : vector<8x512xf32> to vector<8x512xbf16>
    %c0_4 = arith.constant 0 : index
    %c0_5 = arith.constant 0 : index
    %6 = vector.load %arg4[%c0_4, %c0_5] : memref<512x128xbf16, #tpu.memory_space<vmem>>, vector<512x128xbf16>
    %cst = arith.constant dense<0.000000e+00> : vector<8x128xf32>
    %7 = tpu.matmul %5, %6, %cst {dimension_numbers = #tpu.dot_dimension_numbers<[1], [0], [0], [1], [0, 0, 1, 1], [], []>} : vector<8x512xbf16>, vector<512x128xbf16>, vector<8x128xf32> -> vector<8x128xf32>
    %8 = arith.addf %3, %7 : vector<8x128xf32>
    %c0_6 = arith.constant 0 : index
    %c0_7 = arith.constant 0 : index
    %9 = vector.load %arg11[%c0_6, %c0_7] : memref<8x128xf32, #tpu.memory_space<vmem>>, vector<8x128xf32>
    tpu.vector_store %arg11[%c0_6, %c0_7], %8 {strides = array<i32>} : memref<8x128xf32, #tpu.memory_space<vmem>>, vector<8x128xf32>,
    %c0_i32_8 = arith.constant 0 : i32
    %10 = arith.cmpi eq, %arg2, %c0_i32_8 : i32
    %11 = arith.extui %10 : i1 to i32
    %c0_i32_9 = arith.constant 0 : i32
    %12 = arith.cmpi ne, %11, %c0_i32_9 : i32
    scf.if %12 {
      %c0_10 = arith.constant 0 : index
      %c0_11 = arith.constant 0 : index
      %13 = vector.load %arg11[%c0_10, %c0_11] : memref<8x128xf32, #tpu.memory_space<vmem>>, vector<8x128xf32>
      %c0_12 = arith.constant 0 : index
      %c0_13 = arith.constant 0 : index
      %14 = vector.load %arg5[%c0_12, %c0_13] : memref<1x128xf32, #tpu.memory_space<vmem>>, vector<1x128xf32>
      %15 = vector.broadcast %14 : vector<1x128xf32> to vector<8x128xf32>
      %16 = arith.addf %13, %15 : vector<8x128xf32>
      %c0_14 = arith.constant 0 : index
      %c0_15 = arith.constant 0 : index
      %17 = vector.load %arg6[%c0_14, %c0_15] : memref<8x128xf32, #tpu.memory_space<vmem>>, vector<8x128xf32>
      %18 = arith.addf %16, %17 : vector<8x128xf32>
      %c0_16 = arith.constant 0 : index
      %c0_17 = arith.constant 0 : index
      %19 = vector.load %arg9[%c0_16, %c0_17] : memref<8x128xf32, #tpu.memory_space<vmem>>, vector<8x128xf32>
      tpu.vector_store %arg9[%c0_16, %c0_17], %18 {strides = array<i32>} : memref<8x128xf32, #tpu.memory_space<vmem>>, vector<8x128xf32>,
      %cst_18 = arith.constant dense<0.000000e+00> : vector<8xf32>
      %20 = vector.multi_reduction <add>, %18, %cst_18 [1] : vector<8x128xf32> to vector<8xf32>
      %21 = vector.shape_cast %20 : vector<8xf32> to vector<8x1xf32>
      %cst_19 = arith.constant 7.812500e-03 : f32
      %22 = vector.broadcast %cst_19 : f32 to vector<8x1xf32>
      %23 = arith.mulf %21, %22 : vector<8x1xf32>
      %24 = vector.broadcast %23 : vector<8x1xf32> to vector<8x128xf32>
      %25 = arith.subf %18, %24 : vector<8x128xf32>
      %26 = arith.mulf %25, %25 : vector<8x128xf32>
      %cst_20 = arith.constant dense<0.000000e+00> : vector<8xf32>
      %27 = vector.multi_reduction <add>, %26, %cst_20 [1] : vector<8x128xf32> to vector<8xf32>
      %28 = vector.shape_cast %27 : vector<8xf32> to vector<8x1xf32>
      %cst_21 = arith.constant 7.812500e-03 : f32
      %29 = vector.broadcast %cst_21 : f32 to vector<8x1xf32>
      %30 = arith.mulf %28, %29 : vector<8x1xf32>
      %cst_22 = arith.constant 9.99999974E-6 : f32
      %31 = vector.broadcast %cst_22 : f32 to vector<8x1xf32>
      %32 = arith.addf %30, %31 : vector<8x1xf32>
      %33 = math.rsqrt %32 : vector<8x1xf32>
      %34 = vector.broadcast %33 : vector<8x1xf32> to vector<8x128xf32>
      %35 = arith.mulf %25, %34 : vector<8x128xf32>
      %c0_23 = arith.constant 0 : index
      %c0_24 = arith.constant 0 : index
      %36 = vector.load %arg7[%c0_23, %c0_24] : memref<1x128xf32, #tpu.memory_space<vmem>>, vector<1x128xf32>
      %37 = vector.broadcast %36 : vector<1x128xf32> to vector<8x128xf32>
      %38 = arith.mulf %35, %37 : vector<8x128xf32>
      %c0_25 = arith.constant 0 : index
      %c0_26 = arith.constant 0 : index
      %39 = vector.load %arg8[%c0_25, %c0_26] : memref<1x128xf32, #tpu.memory_space<vmem>>, vector<1x128xf32>
      %40 = vector.broadcast %39 : vector<1x128xf32> to vector<8x128xf32>
      %41 = arith.addf %38, %40 : vector<8x128xf32>
      %c0_27 = arith.constant 0 : index
      %c0_28 = arith.constant 0 : index
      %42 = vector.load %arg10[%c0_27, %c0_28] : memref<8x128xf32, #tpu.memory_space<vmem>>, vector<8x128xf32>
      tpu.vector_store %arg10[%c0_27, %c0_28], %41 {strides = array<i32>} : memref<8x128xf32, #tpu.memory_space<vmem>>, vector<8x128xf32>,
    } else {
    }
    return
  }
  func.func @transform_0(%arg0: i32, %arg1: i32, %arg2: i32) -> (i32, i32) {
    %c0_i32 = arith.constant 0 : i32
    return %arg0, %arg2 : i32, i32
  }
  func.func @transform_1(%arg0: i32, %arg1: i32, %arg2: i32) -> (i32, i32) {
    %c0_i32 = arith.constant 0 : i32
    return %arg2, %arg1 : i32, i32
  }
  func.func @transform_2(%arg0: i32, %arg1: i32, %arg2: i32) -> (i32, i32) {
    %c0_i32 = arith.constant 0 : i32
    %c0_i32_0 = arith.constant 0 : i32
    return %c0_i32, %arg1 : i32, i32
  }
  func.func @transform_3(%arg0: i32, %arg1: i32, %arg2: i32) -> (i32, i32) {
    %c0_i32 = arith.constant 0 : i32
    return %arg0, %arg1 : i32, i32
  }
  func.func @transform_4(%arg0: i32, %arg1: i32, %arg2: i32) -> (i32, i32) {
    %c0_i32 = arith.constant 0 : i32
    %c0_i32_0 = arith.constant 0 : i32
    return %c0_i32, %arg1 : i32, i32
  }
  func.func @transform_5(%arg0: i32, %arg1: i32, %arg2: i32) -> (i32, i32) {
    %c0_i32 = arith.constant 0 : i32
    %c0_i32_0 = arith.constant 0 : i32
    return %c0_i32, %arg1 : i32, i32
  }
  func.func @transform_6(%arg0: i32, %arg1: i32, %arg2: i32) -> (i32, i32) {
    %c0_i32 = arith.constant 0 : i32
    return %arg0, %arg1 : i32, i32
  }
  func.func @transform_7(%arg0: i32, %arg1: i32, %arg2: i32) -> (i32, i32) {
    %c0_i32 = arith.constant 0 : i32
    return %arg0, %arg1 : i32, i32
  }
}

module attributes {stable_mosaic.version = 11 : i64} {
  func.func @kernel(%arg0: i32, %arg1: i32, %arg2: i32, %arg3: memref<8x512xf32, #tpu.memory_space<vmem>>, %arg4: memref<512x128xbf16, #tpu.memory_space<vmem>>, %arg5: memref<1x128xf32, #tpu.memory_space<vmem>>, %arg6: memref<8x128xf32, #tpu.memory_space<vmem>>, %arg7: memref<1x128xf32, #tpu.memory_space<vmem>>, %arg8: memref<1x128xf32, #tpu.memory_space<vmem>>, %arg9: memref<8x128xf32, #tpu.memory_space<vmem>>, %arg10: memref<8x128xf32, #tpu.memory_space<vmem>>, %arg11: memref<8x128xf32, #tpu.memory_space<vmem>>) attributes {dimension_semantics = [#tpu.dimension_semantics<parallel>, #tpu.dimension_semantics<parallel>, #tpu.dimension_semantics<arbitrary>], iteration_bounds = array<i64: 2, 1, 1>, scalar_prefetch = 0 : i64, scratch_operands = 1 : i64, tpu.core_type = #tpu.core_type<tc>, window_params = [{transform_indices = @transform_0, window_bounds = array<i64: 8, 512>}, {transform_indices = @transform_1, window_bounds = array<i64: 512, 128>}, {transform_indices = @transform_2, window_bounds = array<i64: 1, 128>}, {transform_indices = @transform_3, window_bounds = array<i64: 8, 128>}, {transform_indices = @transform_4, window_bounds = array<i64: 1, 128>}, {transform_indices = @transform_5, window_bounds = array<i64: 1, 128>}, {transform_indices = @transform_6, window_bounds = array<i64: 8, 128>}, {transform_indices = @transform_7, window_bounds = array<i64: 8, 128>}]} {
    %c0_i32 = arith.constant 0 : i32
    %0 = arith.cmpi eq, %arg2, %c0_i32 : i32
    %1 = arith.extui %0 : i1 to i32
    %c0_i32_0 = arith.constant 0 : i32
    %2 = arith.cmpi ne, %1, %c0_i32_0 : i32
    scf.if %2 {
      %cst_10 = arith.constant 0.000000e+00 : f32
      %13 = vector.broadcast %cst_10 : f32 to vector<8x128xf32>
      %c0_11 = arith.constant 0 : index
      %c0_12 = arith.constant 0 : index
      %14 = vector.load %arg11[%c0_11, %c0_12] : memref<8x128xf32, #tpu.memory_space<vmem>>, vector<8x128xf32>
      tpu.vector_store %arg11[%c0_11, %c0_12], %13 {strides = array<i32>} : memref<8x128xf32, #tpu.memory_space<vmem>>, vector<8x128xf32>,
    } else {
    }
    %c0 = arith.constant 0 : index
    %c0_1 = arith.constant 0 : index
    %3 = vector.load %arg11[%c0, %c0_1] : memref<8x128xf32, #tpu.memory_space<vmem>>, vector<8x128xf32>
    %c0_2 = arith.constant 0 : index
    %c0_3 = arith.constant 0 : index
    %4 = vector.load %arg3[%c0_2, %c0_3] : memref<8x512xf32, #tpu.memory_space<vmem>>, vector<8x512xf32>
    %5 = arith.truncf %4 : vector<8x512xf32> to vector<8x512xbf16>
    %c0_4 = arith.constant 0 : index
    %c0_5 = arith.constant 0 : index
    %6 = vector.load %arg4[%c0_4, %c0_5] : memref<512x128xbf16, #tpu.memory_space<vmem>>, vector<512x128xbf16>
    %cst = arith.constant dense<0.000000e+00> : vector<8x128xf32>
    %7 = tpu.matmul %5, %6, %cst {dimension_numbers = #tpu.dot_dimension_numbers<[1], [0], [0], [1], [0, 0, 1, 1], [], []>} : vector<8x512xbf16>, vector<512x128xbf16>, vector<8x128xf32> -> vector<8x128xf32>
    %8 = arith.addf %3, %7 : vector<8x128xf32>
    %c0_6 = arith.constant 0 : index
    %c0_7 = arith.constant 0 : index
    %9 = vector.load %arg11[%c0_6, %c0_7] : memref<8x128xf32, #tpu.memory_space<vmem>>, vector<8x128xf32>
    tpu.vector_store %arg11[%c0_6, %c0_7], %8 {strides = array<i32>} : memref<8x128xf32, #tpu.memory_space<vmem>>, vector<8x128xf32>,
    %c0_i32_8 = arith.constant 0 : i32
    %10 = arith.cmpi eq, %arg2, %c0_i32_8 : i32
    %11 = arith.extui %10 : i1 to i32
    %c0_i32_9 = arith.constant 0 : i32
    %12 = arith.cmpi ne, %11, %c0_i32_9 : i32
    scf.if %12 {
      %c0_10 = arith.constant 0 : index
      %c0_11 = arith.constant 0 : index
      %13 = vector.load %arg11[%c0_10, %c0_11] : memref<8x128xf32, #tpu.memory_space<vmem>>, vector<8x128xf32>
      %c0_12 = arith.constant 0 : index
      %c0_13 = arith.constant 0 : index
      %14 = vector.load %arg5[%c0_12, %c0_13] : memref<1x128xf32, #tpu.memory_space<vmem>>, vector<1x128xf32>
      %15 = vector.broadcast %14 : vector<1x128xf32> to vector<8x128xf32>
      %16 = arith.addf %13, %15 : vector<8x128xf32>
      %c0_14 = arith.constant 0 : index
      %c0_15 = arith.constant 0 : index
      %17 = vector.load %arg6[%c0_14, %c0_15] : memref<8x128xf32, #tpu.memory_space<vmem>>, vector<8x128xf32>
      %18 = arith.addf %16, %17 : vector<8x128xf32>
      %c0_16 = arith.constant 0 : index
      %c0_17 = arith.constant 0 : index
      %19 = vector.load %arg9[%c0_16, %c0_17] : memref<8x128xf32, #tpu.memory_space<vmem>>, vector<8x128xf32>
      tpu.vector_store %arg9[%c0_16, %c0_17], %18 {strides = array<i32>} : memref<8x128xf32, #tpu.memory_space<vmem>>, vector<8x128xf32>,
      %cst_18 = arith.constant dense<0.000000e+00> : vector<8xf32>
      %20 = vector.multi_reduction <add>, %18, %cst_18 [1] : vector<8x128xf32> to vector<8xf32>
      %21 = vector.shape_cast %20 : vector<8xf32> to vector<8x1xf32>
      %cst_19 = arith.constant 7.812500e-03 : f32
      %22 = vector.broadcast %cst_19 : f32 to vector<8x1xf32>
      %23 = arith.mulf %21, %22 : vector<8x1xf32>
      %24 = vector.broadcast %23 : vector<8x1xf32> to vector<8x128xf32>
      %25 = arith.subf %18, %24 : vector<8x128xf32>
      %26 = arith.mulf %25, %25 : vector<8x128xf32>
      %cst_20 = arith.constant dense<0.000000e+00> : vector<8xf32>
      %27 = vector.multi_reduction <add>, %26, %cst_20 [1] : vector<8x128xf32> to vector<8xf32>
      %28 = vector.shape_cast %27 : vector<8xf32> to vector<8x1xf32>
      %cst_21 = arith.constant 7.812500e-03 : f32
      %29 = vector.broadcast %cst_21 : f32 to vector<8x1xf32>
      %30 = arith.mulf %28, %29 : vector<8x1xf32>
      %cst_22 = arith.constant 9.99999974E-6 : f32
      %31 = vector.broadcast %cst_22 : f32 to vector<8x1xf32>
      %32 = arith.addf %30, %31 : vector<8x1xf32>
      %33 = math.rsqrt %32 : vector<8x1xf32>
      %34 = vector.broadcast %33 : vector<8x1xf32> to vector<8x128xf32>
      %35 = arith.mulf %25, %34 : vector<8x128xf32>
      %c0_23 = arith.constant 0 : index
      %c0_24 = arith.constant 0 : index
      %36 = vector.load %arg7[%c0_23, %c0_24] : memref<1x128xf32, #tpu.memory_space<vmem>>, vector<1x128xf32>
      %37 = vector.broadcast %36 : vector<1x128xf32> to vector<8x128xf32>
      %38 = arith.mulf %35, %37 : vector<8x128xf32>
      %c0_25 = arith.constant 0 : index
      %c0_26 = arith.constant 0 : index
      %39 = vector.load %arg8[%c0_25, %c0_26] : memref<1x128xf32, #tpu.memory_space<vmem>>, vector<1x128xf32>
      %40 = vector.broadcast %39 : vector<1x128xf32> to vector<8x128xf32>
      %41 = arith.addf %38, %40 : vector<8x128xf32>
      %c0_27 = arith.constant 0 : index
      %c0_28 = arith.constant 0 : index
      %42 = vector.load %arg10[%c0_27, %c0_28] : memref<8x128xf32, #tpu.memory_space<vmem>>, vector<8x128xf32>
      tpu.vector_store %arg10[%c0_27, %c0_28], %41 {strides = array<i32>} : memref<8x128xf32, #tpu.memory_space<vmem>>, vector<8x128xf32>,
    } else {
    }
    return
  }
  func.func @transform_0(%arg0: i32, %arg1: i32, %arg2: i32) -> (i32, i32) {
    %c0_i32 = arith.constant 0 : i32
    return %arg0, %arg2 : i32, i32
  }
  func.func @transform_1(%arg0: i32, %arg1: i32, %arg2: i32) -> (i32, i32) {
    %c0_i32 = arith.constant 0 : i32
    return %arg2, %arg1 : i32, i32
  }
  func.func @transform_2(%arg0: i32, %arg1: i32, %arg2: i32) -> (i32, i32) {
    %c0_i32 = arith.constant 0 : i32
    %c0_i32_0 = arith.constant 0 : i32
    return %c0_i32, %arg1 : i32, i32
  }
  func.func @transform_3(%arg0: i32, %arg1: i32, %arg2: i32) -> (i32, i32) {
    %c0_i32 = arith.constant 0 : i32
    return %arg0, %arg1 : i32, i32
  }
  func.func @transform_4(%arg0: i32, %arg1: i32, %arg2: i32) -> (i32, i32) {
    %c0_i32 = arith.constant 0 : i32
    %c0_i32_0 = arith.constant 0 : i32
    return %c0_i32, %arg1 : i32, i32
  }
  func.func @transform_5(%arg0: i32, %arg1: i32, %arg2: i32) -> (i32, i32) {
    %c0_i32 = arith.constant 0 : i32
    %c0_i32_0 = arith.constant 0 : i32
    return %c0_i32, %arg1 : i32, i32
  }
  func.func @transform_6(%arg0: i32, %arg1: i32, %arg2: i32) -> (i32, i32) {
    %c0_i32 = arith.constant 0 : i32
    return %arg0, %arg1 : i32, i32
  }
  func.func @transform_7(%arg0: i32, %arg1: i32, %arg2: i32) -> (i32, i32) {
    %c0_i32 = arith.constant 0 : i32
    return %arg0, %arg1 : i32, i32
  }
}

module attributes {stable_mosaic.version = 11 : i64} {
  func.func @kernel(%arg0: i32, %arg1: i32, %arg2: i32, %arg3: memref<8x128xf32, #tpu.memory_space<vmem>>, %arg4: memref<128x512xbf16, #tpu.memory_space<vmem>>, %arg5: memref<1x512xf32, #tpu.memory_space<vmem>>, %arg6: memref<8x512xf32, #tpu.memory_space<vmem>>, %arg7: memref<8x512xf32, #tpu.memory_space<vmem>>) attributes {dimension_semantics = [#tpu.dimension_semantics<parallel>, #tpu.dimension_semantics<parallel>, #tpu.dimension_semantics<arbitrary>], iteration_bounds = array<i64: 2, 1, 1>, scalar_prefetch = 0 : i64, scratch_operands = 1 : i64, tpu.core_type = #tpu.core_type<tc>, window_params = [{transform_indices = @transform_0, window_bounds = array<i64: 8, 128>}, {transform_indices = @transform_1, window_bounds = array<i64: 128, 512>}, {transform_indices = @transform_2, window_bounds = array<i64: 1, 512>}, {transform_indices = @transform_3, window_bounds = array<i64: 8, 512>}]} {
    %c0_i32 = arith.constant 0 : i32
    %0 = arith.cmpi eq, %arg2, %c0_i32 : i32
    %1 = arith.extui %0 : i1 to i32
    %c0_i32_0 = arith.constant 0 : i32
    %2 = arith.cmpi ne, %1, %c0_i32_0 : i32
    scf.if %2 {
      %cst_10 = arith.constant 0.000000e+00 : f32
      %13 = vector.broadcast %cst_10 : f32 to vector<8x512xf32>
      %c0_11 = arith.constant 0 : index
      %c0_12 = arith.constant 0 : index
      %14 = vector.load %arg7[%c0_11, %c0_12] : memref<8x512xf32, #tpu.memory_space<vmem>>, vector<8x512xf32>
      tpu.vector_store %arg7[%c0_11, %c0_12], %13 {strides = array<i32>} : memref<8x512xf32, #tpu.memory_space<vmem>>, vector<8x512xf32>,
    } else {
    }
    %c0 = arith.constant 0 : index
    %c0_1 = arith.constant 0 : index
    %3 = vector.load %arg7[%c0, %c0_1] : memref<8x512xf32, #tpu.memory_space<vmem>>, vector<8x512xf32>
    %c0_2 = arith.constant 0 : index
    %c0_3 = arith.constant 0 : index
    %4 = vector.load %arg3[%c0_2, %c0_3] : memref<8x128xf32, #tpu.memory_space<vmem>>, vector<8x128xf32>
    %5 = arith.truncf %4 : vector<8x128xf32> to vector<8x128xbf16>
    %c0_4 = arith.constant 0 : index
    %c0_5 = arith.constant 0 : index
    %6 = vector.load %arg4[%c0_4, %c0_5] : memref<128x512xbf16, #tpu.memory_space<vmem>>, vector<128x512xbf16>
    %cst = arith.constant dense<0.000000e+00> : vector<8x512xf32>
    %7 = tpu.matmul %5, %6, %cst {dimension_numbers = #tpu.dot_dimension_numbers<[1], [0], [0], [1], [0, 0, 1, 1], [], []>} : vector<8x128xbf16>, vector<128x512xbf16>, vector<8x512xf32> -> vector<8x512xf32>
    %8 = arith.addf %3, %7 : vector<8x512xf32>
    %c0_6 = arith.constant 0 : index
    %c0_7 = arith.constant 0 : index
    %9 = vector.load %arg7[%c0_6, %c0_7] : memref<8x512xf32, #tpu.memory_space<vmem>>, vector<8x512xf32>
    tpu.vector_store %arg7[%c0_6, %c0_7], %8 {strides = array<i32>} : memref<8x512xf32, #tpu.memory_space<vmem>>, vector<8x512xf32>,
    %c0_i32_8 = arith.constant 0 : i32
    %10 = arith.cmpi eq, %arg2, %c0_i32_8 : i32
    %11 = arith.extui %10 : i1 to i32
    %c0_i32_9 = arith.constant 0 : i32
    %12 = arith.cmpi ne, %11, %c0_i32_9 : i32
    scf.if %12 {
      %c0_10 = arith.constant 0 : index
      %c0_11 = arith.constant 0 : index
      %13 = vector.load %arg7[%c0_10, %c0_11] : memref<8x512xf32, #tpu.memory_space<vmem>>, vector<8x512xf32>
      %c0_12 = arith.constant 0 : index
      %c0_13 = arith.constant 0 : index
      %14 = vector.load %arg5[%c0_12, %c0_13] : memref<1x512xf32, #tpu.memory_space<vmem>>, vector<1x512xf32>
      %15 = vector.broadcast %14 : vector<1x512xf32> to vector<8x512xf32>
      %16 = arith.addf %13, %15 : vector<8x512xf32>
      %cst_14 = arith.constant 5.000000e-01 : f32
      %17 = vector.broadcast %cst_14 : f32 to vector<8x512xf32>
      %18 = arith.mulf %17, %16 : vector<8x512xf32>
      %cst_15 = arith.constant 4.471500e-02 : f32
      %19 = vector.broadcast %cst_15 : f32 to vector<8x512xf32>
      %20 = arith.mulf %19, %16 : vector<8x512xf32>
      %21 = arith.mulf %20, %16 : vector<8x512xf32>
      %22 = arith.mulf %21, %16 : vector<8x512xf32>
      %23 = arith.addf %16, %22 : vector<8x512xf32>
      %cst_16 = arith.constant 0.797884583 : f32
      %24 = vector.broadcast %cst_16 : f32 to vector<8x512xf32>
      %25 = arith.mulf %24, %23 : vector<8x512xf32>
      %26 = math.tanh %25 : vector<8x512xf32>
      %cst_17 = arith.constant 1.000000e+00 : f32
      %27 = vector.broadcast %cst_17 : f32 to vector<8x512xf32>
      %28 = arith.addf %27, %26 : vector<8x512xf32>
      %29 = arith.mulf %18, %28 : vector<8x512xf32>
      %c0_18 = arith.constant 0 : index
      %c0_19 = arith.constant 0 : index
      %30 = vector.load %arg6[%c0_18, %c0_19] : memref<8x512xf32, #tpu.memory_space<vmem>>, vector<8x512xf32>
      tpu.vector_store %arg6[%c0_18, %c0_19], %29 {strides = array<i32>} : memref<8x512xf32, #tpu.memory_space<vmem>>, vector<8x512xf32>,
    } else {
    }
    return
  }
  func.func @transform_0(%arg0: i32, %arg1: i32, %arg2: i32) -> (i32, i32) {
    %c0_i32 = arith.constant 0 : i32
    return %arg0, %arg2 : i32, i32
  }
  func.func @transform_1(%arg0: i32, %arg1: i32, %arg2: i32) -> (i32, i32) {
    %c0_i32 = arith.constant 0 : i32
    return %arg2, %arg1 : i32, i32
  }
  func.func @transform_2(%arg0: i32, %arg1: i32, %arg2: i32) -> (i32, i32) {
    %c0_i32 = arith.constant 0 : i32
    %c0_i32_0 = arith.constant 0 : i32
    return %c0_i32, %arg1 : i32, i32
  }
  func.func @transform_3(%arg0: i32, %arg1: i32, %arg2: i32) -> (i32, i32) {
    %c0_i32 = arith.constant 0 : i32
    return %arg0, %arg1 : i32, i32
  }
}

module attributes {stable_mosaic.version = 11 : i64} {
  func.func @kernel(%arg0: i32, %arg1: i32, %arg2: i32, %arg3: memref<8x128xf32, #tpu.memory_space<vmem>>, %arg4: memref<128x256xbf16, #tpu.memory_space<vmem>>, %arg5: memref<8x256xf32, #tpu.memory_space<vmem>>, %arg6: memref<8x256xf32, #tpu.memory_space<vmem>>) attributes {dimension_semantics = [#tpu.dimension_semantics<parallel>, #tpu.dimension_semantics<parallel>, #tpu.dimension_semantics<arbitrary>], iteration_bounds = array<i64: 2, 1, 1>, scalar_prefetch = 0 : i64, scratch_operands = 1 : i64, tpu.core_type = #tpu.core_type<tc>, window_params = [{transform_indices = @transform_0, window_bounds = array<i64: 8, 128>}, {transform_indices = @transform_1, window_bounds = array<i64: 128, 256>}, {transform_indices = @transform_2, window_bounds = array<i64: 8, 256>}]} {
    %c0_i32 = arith.constant 0 : i32
    %0 = arith.cmpi eq, %arg2, %c0_i32 : i32
    %1 = arith.extui %0 : i1 to i32
    %c0_i32_0 = arith.constant 0 : i32
    %2 = arith.cmpi ne, %1, %c0_i32_0 : i32
    scf.if %2 {
      %cst_10 = arith.constant 0.000000e+00 : f32
      %13 = vector.broadcast %cst_10 : f32 to vector<8x256xf32>
      %c0_11 = arith.constant 0 : index
      %c0_12 = arith.constant 0 : index
      %14 = vector.load %arg6[%c0_11, %c0_12] : memref<8x256xf32, #tpu.memory_space<vmem>>, vector<8x256xf32>
      tpu.vector_store %arg6[%c0_11, %c0_12], %13 {strides = array<i32>} : memref<8x256xf32, #tpu.memory_space<vmem>>, vector<8x256xf32>,
    } else {
    }
    %c0 = arith.constant 0 : index
    %c0_1 = arith.constant 0 : index
    %3 = vector.load %arg6[%c0, %c0_1] : memref<8x256xf32, #tpu.memory_space<vmem>>, vector<8x256xf32>
    %c0_2 = arith.constant 0 : index
    %c0_3 = arith.constant 0 : index
    %4 = vector.load %arg3[%c0_2, %c0_3] : memref<8x128xf32, #tpu.memory_space<vmem>>, vector<8x128xf32>
    %5 = arith.truncf %4 : vector<8x128xf32> to vector<8x128xbf16>
    %c0_4 = arith.constant 0 : index
    %c0_5 = arith.constant 0 : index
    %6 = vector.load %arg4[%c0_4, %c0_5] : memref<128x256xbf16, #tpu.memory_space<vmem>>, vector<128x256xbf16>
    %cst = arith.constant dense<0.000000e+00> : vector<8x256xf32>
    %7 = tpu.matmul %5, %6, %cst {dimension_numbers = #tpu.dot_dimension_numbers<[1], [0], [0], [1], [0, 0, 1, 1], [], []>} : vector<8x128xbf16>, vector<128x256xbf16>, vector<8x256xf32> -> vector<8x256xf32>
    %8 = arith.addf %3, %7 : vector<8x256xf32>
    %c0_6 = arith.constant 0 : index
    %c0_7 = arith.constant 0 : index
    %9 = vector.load %arg6[%c0_6, %c0_7] : memref<8x256xf32, #tpu.memory_space<vmem>>, vector<8x256xf32>
    tpu.vector_store %arg6[%c0_6, %c0_7], %8 {strides = array<i32>} : memref<8x256xf32, #tpu.memory_space<vmem>>, vector<8x256xf32>,
    %c0_i32_8 = arith.constant 0 : i32
    %10 = arith.cmpi eq, %arg2, %c0_i32_8 : i32
    %11 = arith.extui %10 : i1 to i32
    %c0_i32_9 = arith.constant 0 : i32
    %12 = arith.cmpi ne, %11, %c0_i32_9 : i32
    scf.if %12 {
      %c0_10 = arith.constant 0 : index
      %c0_11 = arith.constant 0 : index
      %13 = vector.load %arg6[%c0_10, %c0_11] : memref<8x256xf32, #tpu.memory_space<vmem>>, vector<8x256xf32>
      %c0_12 = arith.constant 0 : index
      %c0_13 = arith.constant 0 : index
      %14 = vector.load %arg5[%c0_12, %c0_13] : memref<8x256xf32, #tpu.memory_space<vmem>>, vector<8x256xf32>
      tpu.vector_store %arg5[%c0_12, %c0_13], %13 {strides = array<i32>} : memref<8x256xf32, #tpu.memory_space<vmem>>, vector<8x256xf32>,
    } else {
    }
    return
  }
  func.func @transform_0(%arg0: i32, %arg1: i32, %arg2: i32) -> (i32, i32) {
    %c0_i32 = arith.constant 0 : i32
    return %arg0, %arg2 : i32, i32
  }
  func.func @transform_1(%arg0: i32, %arg1: i32, %arg2: i32) -> (i32, i32) {
    %c0_i32 = arith.constant 0 : i32
    return %arg2, %arg1 : i32, i32
  }
  func.func @transform_2(%arg0: i32, %arg1: i32, %arg2: i32) -> (i32, i32) {
    %c0_i32 = arith.constant 0 : i32
    return %arg0, %arg1 : i32, i32
  }
}

</mosaic_0001>

<bundles_post_ra>
// kernel: _lambda_.12
= control target key start
LH: loop header
LB: loop body
LE: loop exit
PB: predicated region body
PF: predicated region fallthrough
CT: control target
= control target key end

     0   :  { %s106_s0 = inlined_call_operand.vmem [shape: f32[16,128], index: 0, kind: input, shape index: {}]   ;;  %s107_s1 = inlined_call_operand.vmem [shape: f32[1,128], index: 1, kind: input, shape index: {}]   ;;  %s108_s2 = inlined_call_operand.vmem [shape: f32[1,128], index: 2, kind: input, shape index: {}]   ;;  %s109_s3 = inlined_call_operand.vmem [shape: f32[16,128], index: 3, kind: output, shape index: {}]  }
   0x1   :  { %v14_v0 = vld [vmem:[%s106_s0] sm:$0xff]  ;;  %v15_v1 = vld [vmem:[%s106_s0 + $0x8] sm:$0xff] }
   0x2   :  { %16 = vadd.xlane.f32.xlu0 %v14_v0  ;;  %v62_v17 = vld [vmem:[%s107_s1] ss:$0 sm:$0xff] }
   0x3   :  { %v63_v19 = vld [vmem:[%s108_s2] ss:$0 sm:$0xff] }
   0x6   :  { %18 = vadd.xlane.f32.xlu0 %v15_v1 }
  0x8f   :  { %v17_v2 = vpop.xlane.xlu0 %16 }
  0x90   :  { %v20_v3 = vmul.f32 0.0078125, %v17_v2 }
  0x92   :  { %v22_v4 = vsub.f32 %v14_v0, %v20_v3 }
  0x93   :  { %v19_v5 = vpop.xlane.xlu0 %18 }
  0x94   :  { %v21_v6 = vmul.f32 0.0078125, %v19_v5  ;;  %v24_v7 = vmul.f32 %v22_v4, %v22_v4 }
  0x96   :  { %v23_v8 = vsub.f32 %v15_v1, %v21_v6  ;;  %26 = vadd.xlane.f32.xlu1 %v24_v7 }
  0x98   :  { %v25_v9 = vmul.f32 %v23_v8, %v23_v8 }
  0x9a   :  { %28 = vadd.xlane.f32.xlu1 %v25_v9 }
 0x123   :  { %v27_v10 = vpop.xlane.xlu1 %26 }
 0x124   :  { %v30_v11 = vmul.f32 0.0078125, %v27_v10 }
 0x126   :  { %v32_v12 = vadd.f32 1e-05, %v30_v11 }
 0x127   :  { %v29_v13 = vpop.xlane.xlu1 %28 }
 0x128   :  { %64 = vrsqrt.f32 %v32_v12  ;;  %v31_v14 = vmul.f32 0.0078125, %v29_v13 }
 0x12a   :  { %v33_v15 = vadd.f32 1e-05, %v31_v14 }
 0x12c   :  { %66 = vrsqrt.f32 %v33_v15 }
 0x132   :  { %v65_v16 = vpop.eup %64 }
 0x133   :  { %v36_v18 = vmul.f32 %v65_v16, %v22_v4 }
 0x135   :  { %v45_v20 = vmul.f32 %v62_v17, %v36_v18 }
 0x136   :  { %v67_v21 = vpop.eup %66 }
 0x137   :  { %v54_v22 = vadd.f32 %v63_v19, %v45_v20  ;;  %v37_v23 = vmul.f32 %v67_v21, %v23_v8 }
 0x139   :  { %56 = vst [vmem:[%s109_s3] sm:$0xff] %v54_v22  ;;  %v46_v24 = vmul.f32 %v62_v17, %v37_v23 }
 0x13b   :  { %v55_v25 = vadd.f32 %v63_v19, %v46_v24 }
 0x13d   :  { %57 = vst [vmem:[%s109_s3 + $0x8] sm:$0xff] %v55_v25 }

// kernel: _lambda_.13
= control target key start
LH: loop header
LB: loop body
LE: loop exit
PB: predicated region body
PF: predicated region fallthrough
CT: control target
= control target key end

     0   :  { %s721_s9 = smov 0   ;;  %s723_s10 = smov 0   ;;  %s830_s0 = inlined_call_operand.vmem [shape: f32[16,128], index: 0, kind: input, shape index: {}]   ;;  %s831_s1 = inlined_call_operand.vmem [shape: bf16[128,384], index: 1, kind: input, shape index: {}]   ;;  %s832_s2 = inlined_call_operand.vmem [shape: f32[16,384], index: 2, kind: output, shape index: {}]  }
   0x1   :  { %s725_s11 = smov 0   ;;  %s727_s12 = smov 0  }
   0x2   :  { %s729_s13 = smov 0   ;;  %s731_s14 = smov 0  }
   0x3   :  { %s733_s15 = smov 0  }
   0x4 LB: > { %s27_s16 = sadd.s32 1, %s694_s13  ;;  %s31_s17 = sadd.s32 1, %s698_s14  ;;  %s702_s15 = sphi %s733_s15, %s12_s15   ;;  %s698_s14 = sphi %s731_s14, %s838_s14   ;;  %s694_s13 = sphi %s729_s13, %s837_s13   ;;  %s690_s12 = sphi %s727_s12, %s836_s12   ;;  %s686_s11 = sphi %s725_s11, %s835_s11   ;;  %s682_s10 = sphi %s723_s10, %s834_s10   ;;  %s678_s9 = sphi %s721_s9, %s833_s9  }
   0x5   : > { %p29_p0 = scmp.ge.s32.totalorder %s27_s16, 3  ;;  %s68_s18 = sadd.s32 1, %s682_s10 }
   0x6   : > { %p75_p1 = scmp.ne.s32.totalorder %s682_s10, %s678_s9  ;;  %p76_p2 = scmp.eq.s32.totalorder %s702_s15, 0 }
   0x7   : > { %s840_s16 = smov (%p29_p0, %s27_s16), 0  ;;  %s842_s17 = smov (!%p29_p0, %s31_s17), %s698_s14 }
   0x8   : > { %s64_s19 = ssub.s32 %s694_s13, %s840_s16  ;;  %p77_p3 = por %p76_p2, %p75_p1 }
   0x9   : > { %p33_p4 = scmp.ge.s32.totalorder %s842_s17, 2  ;;  %p66_p5 = scmp.eq.s32.totalorder %s64_s19, 0 }
   0xa   : > { %p535_p6 = scmp.ge.s32.totalorder %s702_s15, 6 }
   0xb   : > { %s844_s17 = smov (%p33_p4, %s842_s17), 0 }
   0xc   : > { %s770_s20 = scalar_select %p66_p5, %s682_s10, %s68_s18  }
   0xd   : > { %129 = sbr.rel (%p535_p6) target bundleno = 34 (0x22), region = 16 }
  0x14   : > { %142 = sbr.rel (!%p77_p3) target bundleno = 34 (0x22), region = 24  ;;  %s144_s21 = sand.u32 (%p77_p3), 1, %s682_s10  }
  0x15   : > { %s537_s22 = sshll.u32 (%p77_p3), %s694_s13, 2  ;;  %s536_s23 = sshll.u32 (%p77_p3), %s144_s21, 6 }
  0x16   : > { %s778_s26 = scalar_lea.vmem (%p77_p3), %s831_s1, %s537_s22  ;;  %s146_s27 = scalar_lea.vmem (%p77_p3), [#allocation3], %s536_s23 }
  0x17   : > { %v167_v0 = vld [vmem:[%s778_s26] sm:$0xf] (%p77_p3)  ;;  %v169_v1 = vld [vmem:[%s778_s26 + $0xc] sm:$0xf] (%p77_p3)  ;;  %v171_v2 = vld [vmem:[%s778_s26 + $0x18] sm:$0xf] (%p77_p3) }
  0x18   : > { %168 = vst [vmem:[%s146_s27] sm:$0xf] (%p77_p3), %v167_v0  ;;  %170 = vst [vmem:[%s146_s27 + $0x4] sm:$0xf] (%p77_p3), %v169_v1  ;;  %v173_v3 = vld [vmem:[%s778_s26 + $0x24] sm:$0xf] (%p77_p3) }
  0x19   : > { %v175_v4 = vld [vmem:[%s778_s26 + $0x30] sm:$0xf] (%p77_p3)  ;;  %172 = vst [vmem:[%s146_s27 + $0x8] sm:$0xf] (%p77_p3), %v171_v2  ;;  %174 = vst [vmem:[%s146_s27 + $0xc] sm:$0xf] (%p77_p3), %v173_v3 }
  0x1a   : > { %176 = vst [vmem:[%s146_s27 + $0x10] sm:$0xf] (%p77_p3), %v175_v4  ;;  %v177_v5 = vld [vmem:[%s778_s26 + $0x3c] sm:$0xf] (%p77_p3)  ;;  %v179_v6 = vld [vmem:[%s778_s26 + $0x48] sm:$0xf] (%p77_p3) }
  0x1b   : > { %v181_v7 = vld [vmem:[%s778_s26 + $0x54] sm:$0xf]  ;;  %178 = vst [vmem:[%s146_s27 + $0x14] sm:$0xf] %v177_v5  ;;  %180 = vst [vmem:[%s146_s27 + $0x18] sm:$0xf] %v179_v6 }
  0x1c   : > { %182 = vst [vmem:[%s146_s27 + $0x1c] sm:$0xf] %v181_v7  ;;  %v183_v8 = vld [vmem:[%s778_s26 + $0x60] sm:$0xf]  ;;  %v185_v9 = vld [vmem:[%s778_s26 + $0x6c] sm:$0xf] }
  0x1d   : > { %v187_v10 = vld [vmem:[%s778_s26 + $0x78] sm:$0xf]  ;;  %184 = vst [vmem:[%s146_s27 + $0x20] sm:$0xf] %v183_v8  ;;  %186 = vst [vmem:[%s146_s27 + $0x24] sm:$0xf] %v185_v9 }
  0x1e   : > { %188 = vst [vmem:[%s146_s27 + $0x28] sm:$0xf] %v187_v10  ;;  %v189_v11 = vld [vmem:[%s778_s26 + $0x84] sm:$0xf]  ;;  %v191_v12 = vld [vmem:[%s778_s26 + $0x90] sm:$0xf] }
  0x1f   : > { %v193_v13 = vld [vmem:[%s778_s26 + $0x9c] sm:$0xf]  ;;  %190 = vst [vmem:[%s146_s27 + $0x2c] sm:$0xf] %v189_v11  ;;  %192 = vst [vmem:[%s146_s27 + $0x30] sm:$0xf] %v191_v12 }
  0x20   : > { %194 = vst [vmem:[%s146_s27 + $0x34] sm:$0xf] %v193_v13  ;;  %v195_v14 = vld [vmem:[%s778_s26 + $0xa8] sm:$0xf]  ;;  %v197_v15 = vld [vmem:[%s778_s26 + $0xb4] sm:$0xf] }
  0x21   : > { %196 = vst [vmem:[%s146_s27 + $0x38] sm:$0xf] %v195_v14  ;;  %198 = vst [vmem:[%s146_s27 + $0x3c] sm:$0xf] %v197_v15 }
  0x22 PF: > { %p538_p7 = scmp.ge.s32.totalorder %s702_s15, 1  ;;  %p252_p8 = scmp.lt.s32.totalorder %s702_s15, 7 }
  0x24   : > { %p253_p9 = pnand %p538_p7, %p252_p8 }
  0x25   : > { %s259_s28 = sand.u32 (!%p253_p9), 1, %s678_s9   ;;  %v704_v16 = vmov (!%p253_p9), 0.0   ;;  %vm705_vm0 = vmmov (!%p253_p9), 0   ;;  %p290_p10 = scmp.lt.s32.totalorder (!%p253_p9), %s690_s12, 1 }
  0x26   : > { %256 = sbr.rel (%p253_p9) target bundleno = 287 (0x11f), region = 65  ;;  %561 = vmatprep.subr.bf16.mxu0 (!%p253_p9), %v704_v16  ;;  %s539_s29 = sshll.u32 (!%p253_p9), %s259_s28, 6  ;;  %577 = vmatprep.mubr.msk.bf16.mxu0 (!%p253_p9), %vm705_vm0, %v704_v16 }
  0x27   : > { %s261_s30 = scalar_lea.vmem (!%p253_p9), [#allocation3], %s539_s29  ;;  %p300_p11 = scmp.lt.s32.totalorder (!%p253_p9), %s686_s11, 2 }
  0x28   : > { %v640_v17 = vld [vmem:[%s261_s30] sm:$0xff] (!%p253_p9)   ;;  %v641_v18 = vld [vmem:[%s261_s30 + $0x8] sm:$0xff] (!%p253_p9)   ;;  %v642_v19 = vld [vmem:[%s261_s30 + $0x10] sm:$0xff] (!%p253_p9)  }
  0x29   : > { %562 = vmatpush3.bf16.msra.mxu0 (!%p253_p9), %v640_v17  ;;  %v643_v20 = vld [vmem:[%s261_s30 + $0x18] sm:$0xff] (!%p253_p9)   ;;  %v644_v21 = vld [vmem:[%s261_s30 + $0x20] sm:$0xff] (!%p253_p9)   ;;  %v645_v22 = vld [vmem:[%s261_s30 + $0x28] sm:$0xff] (!%p253_p9)  }
  0x2a   : > { %563 = vmatprep.subr.bf16.mxu0 (!%p253_p9), %v704_v16  ;;  %v646_v23 = vld [vmem:[%s261_s30 + $0x30] sm:$0xff] (!%p253_p9)   ;;  %v647_v24 = vld [vmem:[%s261_s30 + $0x38] sm:$0xff] (!%p253_p9)  }
  0x2d   : > { %564 = vmatpush3.bf16.msra.mxu0 %v641_v18  ;;  %s846_s12 = smov (!%p290_p10, %s690_s12), 1  ;;  %s848_s11 = smov (!%p300_p11, %s686_s11), 2 }
  0x2e   : > { %565 = vmatprep.subr.bf16.mxu0 %v704_v16  ;;  %s540_s3 = sshll.u32 %s846_s12, 3  ;;  %s581_s7 = smul.u32 3, %s846_s12 }
  0x2f   : > { %s296_s6 = scalar_lea.vmem %s830_s0, %s540_s3 }
  0x30   : > { %v313_v25 = vld [vmem:[%s296_s6] sm:$0xff]  ;;  %s303_s8 = sadd.s32 %s581_s7, %s848_s11 }
  0x31   : > { %566 = vmatpush3.bf16.msra.mxu0 %v642_v19  ;;  %v314_v26 = vpack.c.bf16 %v313_v25, %v313_v25  ;;  %s541_s9 = sshll.u32 %s303_s8, 3 }
  0x32   : > { %567 = vmatprep.subr.bf16.mxu0 %v704_v16  ;;  %s305_s21 = scalar_lea.vmem %s832_s2, %s541_s9 }
  0x35   : > { %568 = vmatpush3.bf16.msra.mxu0 %v643_v20 }
  0x36   : > { %569 = vmatprep.subr.bf16.mxu0 %v704_v16 }
  0x39   : > { %570 = vmatpush3.bf16.msra.mxu0 %v644_v21 }
  0x3a   : > { %571 = vmatprep.subr.bf16.mxu0 %v704_v16 }
  0x3d   : > { %572 = vmatpush3.bf16.msra.mxu0 %v645_v22 }
  0x3e   : > { %573 = vmatprep.subr.bf16.mxu0 %v704_v16 }
  0x41   : > { %574 = vmatpush3.bf16.msra.mxu0 %v646_v23 }
  0x42   : > { %575 = vmatprep.subr.bf16.mxu0 %v704_v16 }
  0x45   : > { %576 = vmatpush3.bf16.msra.mxu0 %v647_v24 }
  0x48   : > { %578 = vmatmul.mubr.bf16.vlgmr.msra.gmra.mrb[0].mxu0 %v314_v26 }
 0x11b   : > { %v413_v27 = vpop.f32.mrb[0].mxu0 }
 0x11c   : > { %425 = vst [vmem:[%s305_s21] sm:$0xff] %v413_v27  ;;  %v579_v28 = vpop.f32.mrb[1].mxu0 }
 0x11d   : > { %v416_v29 = vpop.f32.mrb[2].mxu0 }
 0x11e   : > { %v580_v30 = vpop.f32.mrb[3].mxu0 }
 0x11f PF: > { %s12_s15 = sadd.s32 1, %s702_s15   ;;  %s833_s9 = smov %s682_s10 }
 0x120   : > { %p9_p12 = scmp.ge.s32.totalorder %s12_s15, 8   ;;  %s834_s10 = smov %s770_s20 }
 0x121   : > { %s835_s11 = smov %s694_s13  ;;  %s836_s12 = smov %s698_s14 }
 0x122   : > { %s837_s13 = smov %s840_s16  ;;  %s838_s14 = smov %s844_s17 }
 0x123   :  { %11 = sbr.rel (!%p9_p12) target bundleno = 4 (0x4), region = 115 }

// kernel: _lambda_.15
= control target key start
LH: loop header
LB: loop body
LE: loop exit
PB: predicated region body
PF: predicated region fallthrough
CT: control target
= control target key end

     0   :  { %s937_s24 = smov 0   ;;  %s939_s25 = smov 0   ;;  %s1015_s0 = inlined_call_operand.vmem [shape: f32[16,128], index: 0, kind: input, shape index: {}]   ;;  %s1016_s1 = inlined_call_operand.vmem [shape: bf16[128,128], index: 1, kind: input, shape index: {}]   ;;  %s1017_s2 = inlined_call_operand.vmem [shape: f32[1,128], index: 2, kind: input, shape index: {}]   ;;  %s1018_s3 = inlined_call_operand.vmem [shape: f32[16,128], index: 3, kind: input, shape index: {}]   ;;  %s1019_s4 = inlined_call_operand.vmem [shape: f32[1,128], index: 4, kind: input, shape index: {}]   ;;  %s1020_s5 = inlined_call_operand.vmem [shape: f32[1,128], index: 5, kind: input, shape index: {}]   ;;  %s1021_s6 = inlined_call_operand.vmem [shape: f32[16,128], index: 6, kind: output, shape index: {0}]   ;;  %s1022_s7 = inlined_call_operand.vmem [shape: f32[16,128], index: 7, kind: output, shape index: {1}]  }
   0x1   :  { %s941_s26 = smov 0  }
   0x2 LB: > { %s37_s27 = sadd.s32 1, %s889_s25  ;;  %p788_p0 = scmp.ge.s32.totalorder %s893_s26, 1  ;;  %s893_s26 = sphi %s941_s26, %s18_s26   ;;  %s889_s25 = sphi %s939_s25, %s1024_s25   ;;  %s885_s24 = sphi %s937_s24, %s1023_s24  }
   0x3   : > { %p39_p1 = scmp.ge.s32.totalorder %s37_s27, 2  ;;  %p321_p2 = scmp.lt.s32.totalorder %s893_s26, 3 }
   0x5   : > { %s1026_s27 = smov (%p39_p1, %s37_s27), 0  ;;  %p322_p3 = pnand %p788_p0, %p321_p2 }
   0x6   : > { %v861_v0 = vld [vmem:[%s1016_s1] sm:$0xff] (!%p322_p3)   ;;  %v895_v1 = vmov (!%p322_p3), 0.0   ;;  %v862_v2 = vld [vmem:[%s1016_s1 + $0x8] sm:$0xff] (!%p322_p3)   ;;  %vm896_vm0 = vmmov (!%p322_p3), 0   ;;  %v863_v3 = vld [vmem:[%s1016_s1 + $0x10] sm:$0xff] (!%p322_p3)   ;;  %p388_p4 = scmp.lt.s32.totalorder (!%p322_p3), %s885_s24, 1 }
   0x7   : > { %325 = sbr.rel (%p322_p3) target bundleno = 567 (0x237), region = 44  ;;  %815 = vmatprep.subr.bf16.mxu0 (!%p322_p3), %v895_v1  ;;  %831 = vmatprep.mubr.msk.bf16.mxu0 (!%p322_p3), %vm896_vm0, %v895_v1  ;;  %v864_v4 = vld [vmem:[%s1016_s1 + $0x18] sm:$0xff] (!%p322_p3)   ;;  %v865_v5 = vld [vmem:[%s1016_s1 + $0x20] sm:$0xff] (!%p322_p3)   ;;  %v866_v6 = vld [vmem:[%s1016_s1 + $0x28] sm:$0xff] (!%p322_p3)  }
   0x8   : > { %816 = vmatpush3.bf16.msra.mxu0 (!%p322_p3), %v861_v0  ;;  %v867_v7 = vld [vmem:[%s1016_s1 + $0x30] sm:$0xff] (!%p322_p3)   ;;  %v868_v8 = vld [vmem:[%s1016_s1 + $0x38] sm:$0xff] (!%p322_p3)   ;;  %v801_v11 = vld [vmem:[%s1017_s2] ss:$0 sm:$0xff] (!%p322_p3) }
   0x9   : > { %817 = vmatprep.subr.bf16.mxu0 (!%p322_p3), %v895_v1  ;;  %v802_v27 = vld [vmem:[%s1019_s4] ss:$0 sm:$0xff] (!%p322_p3) }
   0xa   : > { %v803_v29 = vld [vmem:[%s1020_s5] ss:$0 sm:$0xff] (!%p322_p3) }
   0xc   : > { %818 = vmatpush3.bf16.msra.mxu0 (!%p322_p3), %v862_v2 }
   0xd   : > { %819 = vmatprep.subr.bf16.mxu0 (!%p322_p3), %v895_v1 }
   0xe   : > { %s1028_s24 = smov (!%p388_p4, %s885_s24), 1 }
   0xf   : > { %s973_s17 = sshll.u32 %s1028_s24, 3 }
  0x10   : > { %820 = vmatpush3.bf16.msra.mxu0 %v863_v3  ;;  %s394_s22 = scalar_lea.vmem %s1015_s0, %s973_s17  ;;  %s413_s30 = scalar_lea.vmem %s1018_s3, %s973_s17 }
  0x11   : > { %821 = vmatprep.subr.bf16.mxu0 %v895_v1  ;;  %v441_v9 = vld [vmem:[%s394_s22] sm:$0xff]  ;;  %s426_s12 = scalar_lea.vmem %s1021_s6, %s973_s17  ;;  %s433_s20 = scalar_lea.vmem %s1022_s7, %s973_s17 }
  0x12   : > { %v442_v10 = vpack.c.bf16 %v441_v9, %v441_v9  ;;  %v561_v13 = vld [vmem:[%s413_s30] sm:$0xff] }
  0x14   : > { %822 = vmatpush3.bf16.msra.mxu0 %v864_v4 }
  0x15   : > { %823 = vmatprep.subr.bf16.mxu0 %v895_v1 }
  0x18   : > { %824 = vmatpush3.bf16.msra.mxu0 %v865_v5 }
  0x19   : > { %825 = vmatprep.subr.bf16.mxu0 %v895_v1 }
  0x1c   : > { %826 = vmatpush3.bf16.msra.mxu0 %v866_v6 }
  0x1d   : > { %827 = vmatprep.subr.bf16.mxu0 %v895_v1 }
  0x20   : > { %828 = vmatpush3.bf16.msra.mxu0 %v867_v7 }
  0x21   : > { %829 = vmatprep.subr.bf16.mxu0 %v895_v1 }
  0x24   : > { %830 = vmatpush3.bf16.msra.mxu0 %v868_v8 }
  0x27   : > { %832 = vmatmul.mubr.bf16.vlgmr.msra.gmra.mrb[0].mxu0 %v442_v10 }
  0xfa   : > { %v541_v12 = vpop.f32.mrb[0].mxu0 }
  0xfb   : > { %v560_v14 = vadd.f32 %v801_v11, %v541_v12  ;;  %v833_v15 = vpop.f32.mrb[1].mxu0 }
  0xfc   : > { %v544_v16 = vpop.f32.mrb[2].mxu0 }
  0xfd   : > { %v562_v17 = vadd.f32 %v561_v13, %v560_v14  ;;  %v834_v18 = vpop.f32.mrb[3].mxu0 }
  0xff   : > { %563 = vst [vmem:[%s426_s12] sm:$0xff] %v562_v17  ;;  %564 = vadd.xlane.f32.xlu0 %v562_v17 }
 0x18c   : > { %v565_v19 = vpop.xlane.xlu0 %564 }
 0x18d   : > { %v566_v20 = vmul.f32 0.0078125, %v565_v19 }
 0x18f   : > { %v567_v21 = vsub.f32 %v562_v17, %v566_v20 }
 0x191   : > { %v568_v22 = vmul.f32 %v567_v21, %v567_v21 }
 0x193   : > { %569 = vadd.xlane.f32.xlu0 %v568_v22 }
 0x220   : > { %v570_v23 = vpop.xlane.xlu0 %569 }
 0x221   : > { %v571_v24 = vmul.f32 0.0078125, %v570_v23 }
 0x223   : > { %v572_v25 = vadd.f32 1e-05, %v571_v24 }
 0x225   : > { %869 = vrsqrt.f32 %v572_v25 }
 0x22f   : > { %v870_v26 = vpop.eup %869 }
 0x230   : > { %v574_v28 = vmul.f32 %v870_v26, %v567_v21 }
 0x232   : > { %v582_v30 = vmul.f32 %v802_v27, %v574_v28 }
 0x234   : > { %v590_v31 = vadd.f32 %v803_v29, %v582_v30 }
 0x236   : > { %591 = vst [vmem:[%s433_s20] sm:$0xff] %v590_v31 }
 0x237 PF: > { %s18_s26 = sadd.s32 1, %s893_s26   ;;  %s1023_s24 = smov %s889_s25 }
 0x238   : > { %p15_p5 = scmp.ge.s32.totalorder %s18_s26, 4   ;;  %s1024_s25 = smov %s1026_s27 }
 0x23a   :  { %17 = sbr.rel (!%p15_p5) target bundleno = 2 (0x2), region = 109 }

// kernel: _lambda_.14
= control target key start
LH: loop header
LB: loop body
LE: loop exit
PB: predicated region body
PF: predicated region fallthrough
CT: control target
= control target key end

     0   :  { %s777_s6 = smov 0   ;;  %s891_s0 = inlined_call_operand.vmem [shape: f32[2,8,384], index: 0, kind: input, shape index: {}]   ;;  %s892_s1 = inlined_call_operand.vmem [shape: f32[2,8,128], index: 1, kind: output, shape index: {}]  }
   0x1 LB: > { %s643_s7 = sadd.s32 4294967295, %s760_s6   ;;  %p647_p0 = scmp.ge.s32.totalorder %s760_s6, 1  ;;  %s760_s6 = sphi %s777_s6, %s11_s6  }
   0x2   : > { %p87_p1 = scmp.lt.s32.totalorder %s760_s6, 3 }
   0x4   : > { %p88_p2 = pnand %p647_p0, %p87_p1 }
   0x5   : > { %p106_p3 = scmp.lt.s32.totalorder (!%p88_p2), %s643_s7, 1  ;;  %v762_v0 = vmov (!%p88_p2), 0.0   ;;  %vm763_vm0 = vmmov (!%p88_p2), 0   ;;  %vm128_vm1 = vcmask (!%p88_p2), 261120   ;;  %v119_v7 = vlaneseq (!%p88_p2)  ;;  %s764_s12 = smov (!%p88_p2), 96  }
   0x6   : > { %91 = sbr.rel (%p88_p2) target bundleno = 1476 (0x5c4), region = 24  ;;  %676 = vmatprep.subr.bf16.mxu0 (!%p88_p2), %v762_v0  ;;  %678 = vmatprep.mubr.msk.bf16.mxu0 (!%p88_p2), %vm763_vm0, %v762_v0  ;;  %vm176_vm3 = vcmask (!%p88_p2), 64512   ;;  %s765_s13 = smov (!%p88_p2), 64   ;;  %vm192_vm4 = vcmask (!%p88_p2), 1043456   ;;  %vm585_vm5 = vcmask (!%p88_p2), 523264   ;;  %vm587_vm6 = vcmask (!%p88_p2), 785408  }
   0x7   : > { %682 = vmatprep.subr.bf16.mxu1 (!%p88_p2), %v762_v0  ;;  %684 = vmatprep.mubr.msk.bf16.mxu1 (!%p88_p2), %vm763_vm0, %v762_v0  ;;  %v806_v8 = vshrl.u32 (!%p88_p2), %v119_v7, 7  ;;  %v808_v9 = vand.u32 (!%p88_p2), 127, %v119_v7  ;;  %s766_s14 = smov (!%p88_p2), 32  }
   0x9   : > { %vm123_vm2 = vcmp.le.s32.totalorder (!%p88_p2), %v808_v9, %v806_v8 }
   0xd   : > { %s894_s7 = smov (!%p106_p3, %s643_s7), 1 }
   0xe   : > { %s724_s8 = smul.u32 24, %s894_s7  ;;  %s649_s15 = sshll.u32 %s894_s7, 3 }
   0xf   : > { %s114_s18 = scalar_lea.vmem %s892_s1, %s649_s15 }
  0x10   : > { %s797_s11 = scalar_lea.vmem %s891_s0, %s724_s8 }
  0x11   : > { %v117_v1 = vld [vmem:[%s797_s11 + $0x8] sm:$0xff]  ;;  %v116_v2 = vld [vmem:[%s797_s11] sm:$0xff]  ;;  %v118_v21 = vld [vmem:[%s797_s11 + $0x10] sm:$0xff] }
  0x12   : > { %v126_v3 = vpack.c.bf16 %v117_v1, %v117_v1  ;;  %v124_v5 = vmul.f32 0.17677669, %v116_v2  ;;  %v823_v22 = vpack.c.bf16 %v118_v21, %v118_v21 }
  0x14   : > { %v133_v4 = vsel %vm128_vm1, %v126_v3, 0  ;;  %v125_v6 = vpack.c.bf16 %v124_v5, %v124_v5  ;;  %240 = vrot.lane.b32.xlu1 %v126_v3, %s764_s12  ;;  %v194_v23 = vsel %vm192_vm4, %v823_v22, 0 }
  0x15   : > { %677 = vmatpush3.bf16.xpose.msra.mxu0 %v133_v4  ;;  %683 = vmatpush3.bf16.msra.mxu1 %v194_v23 }
  0x16   : > { %694 = vmatprep.subr.bf16.mxu0 %v762_v0  ;;  %688 = vmatprep.subr.bf16.mxu1 %v762_v0 }
  0x18   : > { %237 = vrot.lane.b32.xlu1 %v125_v6, %s764_s12 }
  0x1c   : > { %679 = vmatmul.mubr.msk.bf16.vlgmr.msra.gmra.mrb[0].mxu0 %vm128_vm1, %v125_v6  ;;  %350 = vrot.lane.b32.xlu1 %v125_v6, %s765_s13 }
  0x1d   : > { %696 = vmatprep.mubr.msk.bf16.mxu0 %vm763_vm0, %v762_v0 }
  0x20   : > { %463 = vrot.lane.b32.xlu1 %v126_v3, %s766_s14 }
  0x24   : > { %461 = vrot.lane.b32.xlu1 %v125_v6, %s766_s14 }
  0x86   : > { %v241_v26 = vpop.permute.xlu1 %240 }
  0x87   : > { %v246_v28 = vsel %vm128_vm1, %v241_v26, 0 }
  0x8a   : > { %v238_v30 = vpop.permute.xlu1 %237 }
  0x8e   : > { %v351_v32 = vpop.permute.xlu1 %350 }
  0x92   : > { %v464_v34 = vpop.permute.xlu1 %463 }
  0x93   : > { %v469_v35 = vsel %vm128_vm1, %v464_v34, 0 }
  0x96   : > { %v462_v36 = vpop.permute.xlu1 %461 }
  0xef   : > { %v169_v10 = vpop.f32.mrb[0].mxu0 }
  0xf0   : > { %v175_v11 = vsel %vm123_vm2, %v169_v10, -1e+30  ;;  %v680_v12 = vpop.f32.mrb[1].mxu0 }
  0xf1   : > { %v172_v13 = vpop.f32.mrb[2].mxu0  ;;  %v177_v14 = vsel %vm176_vm3, %v175_v11, -inf }
  0xf2   : > { %178 = vmax.xlane.f32.xlu0 %v177_v14  ;;  %v681_v15 = vpop.f32.mrb[3].mxu0 }
 0x17f   : > { %v179_v16 = vpop.xlane.xlu0 %178 }
 0x180   : > { %v180_v17 = vsub.f32 %v175_v11, %v179_v16 }
 0x182   : > { %v181_v18 = vmul.f32 1.442695, %v180_v17 }
 0x184   : > { %738 = vpow2.f32 %v181_v18 }
 0x18e   : > { %v739_v19 = vpop.eup %738 }
 0x18f   : > { %v183_v20 = vsel %vm176_vm3, %v739_v19, 0.0 }
 0x190   : > { %184 = vadd.xlane.f32.xlu0 %v183_v20 }
 0x1a6   : > { %352 = vrot.lane.b32.xlu0 %v126_v3, %s765_s13 }
 0x21d   : > { %v185_v24 = vpop.xlane.xlu0 %184 }
 0x21e   : > { %740 = vrcp.f32 %v185_v24 }
 0x221   : > { %v353_v31 = vpop.permute.xlu0 %352 }
 0x222   : > { %v358_v33 = vsel %vm128_vm1, %v353_v31, 0 }
 0x228   : > { %v741_v25 = vpop.eup %740 }
 0x229   : > { %v187_v27 = vmul.f32 %v741_v25, %v739_v19 }
 0x22b   : > { %v188_v29 = vpack.c.bf16 %v187_v27, %v187_v27 }
 0x22d   : > { %685 = vmatmul.mubr.msk.bf16.vlgmr.msra.gmra.mrb[0].mxu1 %vm176_vm3, %v188_v29 }
 0x22e   : > { %689 = vmatpush3.bf16.xpose.msra.mxu1 %v246_v28  ;;  %690 = vmatprep.mubr.msk.bf16.mxu1 %vm763_vm0, %v762_v0 }
 0x22f   : > { %700 = vmatprep.subr.bf16.mxu1 %v762_v0 }
 0x235   : > { %691 = vmatmul.mubr.msk.bf16.vlgmr.msra.gmra.mrb[4].mxu1 %vm128_vm1, %v238_v30 }
 0x236   : > { %701 = vmatpush3.bf16.xpose.msra.mxu1 %v358_v33  ;;  %702 = vmatprep.mubr.msk.bf16.mxu1 %vm763_vm0, %v762_v0 }
 0x237   : > { %712 = vmatprep.subr.bf16.mxu1 %v762_v0 }
 0x23d   : > { %703 = vmatmul.mubr.msk.bf16.vlgmr.msra.gmra.mrb[8].mxu1 %vm128_vm1, %v351_v32 }
 0x23e   : > { %713 = vmatpush3.bf16.xpose.msra.mxu1 %v469_v35  ;;  %714 = vmatprep.mubr.msk.bf16.mxu1 %vm763_vm0, %v762_v0 }
 0x245   : > { %715 = vmatmul.mubr.msk.bf16.vlgmr.msra.gmra.mrb[12].mxu1 %vm128_vm1, %v462_v36 }
 0x300   : > { %v844_v37 = vpop.f32.mrb[0].mxu1 }
 0x301   : > { %v686_v38 = vpop.f32.mrb[1].mxu1 }
 0x302   : > { %v233_v39 = vpop.f32.mrb[2].mxu1 }
 0x303   : > { %v687_v40 = vpop.f32.mrb[3].mxu1 }
 0x308   : > { %v282_v41 = vpop.f32.mrb[4].mxu1 }
 0x309   : > { %v288_v42 = vsel %vm123_vm2, %v282_v41, -1e+30  ;;  %v692_v43 = vpop.f32.mrb[5].mxu1 }
 0x30a   : > { %v285_v44 = vpop.f32.mrb[6].mxu1  ;;  %v289_v45 = vsel %vm176_vm3, %v288_v42, -inf }
 0x30b   : > { %290 = vmax.xlane.f32.xlu1 %v289_v45  ;;  %v693_v46 = vpop.f32.mrb[7].mxu1 }
 0x310   : > { %v394_v47 = vpop.f32.mrb[8].mxu1 }
 0x311   : > { %v400_v48 = vsel %vm123_vm2, %v394_v47, -1e+30  ;;  %v704_v49 = vpop.f32.mrb[9].mxu1 }
 0x312   : > { %v401_v50 = vsel %vm176_vm3, %v400_v48, -inf  ;;  %v397_v51 = vpop.f32.mrb[10].mxu1 }
 0x313   : > { %402 = vmax.xlane.f32.xlu0 %v401_v50  ;;  %v705_v52 = vpop.f32.mrb[11].mxu1 }
 0x318   : > { %v505_v53 = vpop.f32.mrb[12].mxu1 }
 0x319   : > { %v511_v54 = vsel %vm123_vm2, %v505_v53, -1e+30  ;;  %v716_v55 = vpop.f32.mrb[13].mxu1 }
 0x31a   : > { %v512_v56 = vsel %vm176_vm3, %v511_v54, -inf  ;;  %v508_v57 = vpop.f32.mrb[14].mxu1 }
 0x31b   : > { %513 = vmax.xlane.f32.xlu1 %v512_v56  ;;  %v717_v58 = vpop.f32.mrb[15].mxu1 }
 0x398   : > { %v291_v59 = vpop.xlane.xlu1 %290 }
 0x399   : > { %v292_v60 = vsub.f32 %v288_v42, %v291_v59 }
 0x39b   : > { %v293_v61 = vmul.f32 1.442695, %v292_v60 }
 0x39d   : > { %742 = vpow2.f32 %v293_v61 }
 0x3a0   : > { %v403_v62 = vpop.xlane.xlu0 %402 }
 0x3a1   : > { %v404_v63 = vsub.f32 %v400_v48, %v403_v62 }
 0x3a3   : > { %v405_v1 = vmul.f32 1.442695, %v404_v63 }
 0x3a5   : > { %744 = vpow2.f32 %v405_v1 }
 0x3a7   : > { %v743_v2 = vpop.eup %742 }
 0x3a8   : > { %v295_v3 = vsel %vm176_vm3, %v743_v2, 0.0  ;;  %v514_v6 = vpop.xlane.xlu1 %513 }
 0x3a9   : > { %296 = vadd.xlane.f32.xlu1 %v295_v3  ;;  %v515_v7 = vsub.f32 %v511_v54, %v514_v6 }
 0x3ab   : > { %v516_v8 = vmul.f32 1.442695, %v515_v7 }
 0x3ad   : > { %746 = vpow2.f32 %v516_v8 }
 0x3af   : > { %v745_v4 = vpop.eup %744 }
 0x3b0   : > { %v407_v5 = vsel %vm176_vm3, %v745_v4, 0.0 }
 0x3b1   : > { %408 = vadd.xlane.f32.xlu0 %v407_v5 }
 0x3b7   : > { %v747_v9 = vpop.eup %746 }
 0x3b8   : > { %v518_v10 = vsel %vm176_vm3, %v747_v9, 0.0 }
 0x3ba   : > { %413 = vrot.lane.b32.xlu1 %v823_v22, %s765_s13 }
 0x3c7   : > { %302 = vrot.lane.b32.xlu0 %v823_v22, %s764_s12 }
 0x3de   : > { %519 = vadd.xlane.f32.xlu1 %v518_v10 }
 0x3ef   : > { %524 = vrot.lane.b32.xlu1 %v823_v22, %s766_s14 }
 0x436   : > { %v297_v11 = vpop.xlane.xlu1 %296 }
 0x437   : > { %748 = vrcp.f32 %v297_v11 }
 0x43a   : > { %v414_v17 = vpop.permute.xlu1 %413 }
 0x43b   : > { %v419_v19 = vsel %vm192_vm4, %v414_v17, 0 }
 0x43e   : > { %v409_v12 = vpop.xlane.xlu0 %408 }
 0x43f   : > { %750 = vrcp.f32 %v409_v12 }
 0x441   : > { %v749_v13 = vpop.eup %748 }
 0x442   : > { %v299_v14 = vmul.f32 %v749_v13, %v743_v2  ;;  %v303_v15 = vpop.permute.xlu0 %302 }
 0x443   : > { %v308_v16 = vsel %vm192_vm4, %v303_v15, 0 }
 0x444   : > { %695 = vmatpush3.bf16.msra.mxu0 %v308_v16  ;;  %v300_v18 = vpack.c.bf16 %v299_v14, %v299_v14 }
 0x445   : > { %706 = vmatprep.subr.bf16.mxu0 %v762_v0 }
 0x447   : > { %697 = vmatmul.mubr.msk.bf16.vlgmr.msra.gmra.mrb[4].mxu0 %vm176_vm3, %v300_v18 }
 0x448   : > { %707 = vmatpush3.bf16.msra.mxu0 %v419_v19  ;;  %708 = vmatprep.mubr.msk.bf16.mxu0 %vm763_vm0, %v762_v0 }
 0x449   : > { %v751_v20 = vpop.eup %750  ;;  %718 = vmatprep.subr.bf16.mxu0 %v762_v0 }
 0x44a   : > { %v411_v21 = vmul.f32 %v751_v20, %v745_v4 }
 0x44c   : > { %v412_v22 = vpack.c.bf16 %v411_v21, %v411_v21 }
 0x44f   : > { %709 = vmatmul.mubr.msk.bf16.vlgmr.msra.gmra.mrb[8].mxu0 %vm176_vm3, %v412_v22 }
 0x450   : > { %720 = vmatprep.mubr.msk.bf16.mxu0 %vm763_vm0, %v762_v0 }
 0x46b   : > { %v520_v23 = vpop.xlane.xlu1 %519 }
 0x46c   : > { %752 = vrcp.f32 %v520_v23 }
 0x46f   : > { %v525_v24 = vpop.permute.xlu1 %524 }
 0x470   : > { %v530_v25 = vsel %vm192_vm4, %v525_v24, 0 }
 0x471   : > { %719 = vmatpush3.bf16.msra.mxu0 %v530_v25 }
 0x476   : > { %v753_v26 = vpop.eup %752 }
 0x477   : > { %v522_v27 = vmul.f32 %v753_v26, %v747_v9 }
 0x479   : > { %v523_v28 = vpack.c.bf16 %v522_v27, %v522_v27 }
 0x47b   : > { %721 = vmatmul.mubr.msk.bf16.vlgmr.msra.gmra.mrb[12].mxu0 %vm176_vm3, %v523_v28 }
 0x51a   : > { %v344_v29 = vpop.f32.mrb[4].mxu0 }
 0x51b   : > { %573 = vrot.lane.b32.xlu0 %v344_v29, %s766_s14  ;;  %v698_v30 = vpop.f32.mrb[5].mxu0 }
 0x51c   : > { %v347_v31 = vpop.f32.mrb[6].mxu0 }
 0x51d   : > { %v699_v32 = vpop.f32.mrb[7].mxu0 }
 0x522   : > { %v455_v33 = vpop.f32.mrb[8].mxu0 }
 0x523   : > { %577 = vrot.lane.b32.xlu1 %v455_v33, %s765_s13  ;;  %v710_v0 = vpop.f32.mrb[9].mxu0 }
 0x524   : > { %v458_v34 = vpop.f32.mrb[10].mxu0 }
 0x525   : > { %v711_v35 = vpop.f32.mrb[11].mxu0 }
 0x54e   : > { %v566_v36 = vpop.f32.mrb[12].mxu0 }
 0x54f   : > { %581 = vrot.lane.b32.xlu0 %v566_v36, %s764_s12  ;;  %v722_v38 = vpop.f32.mrb[13].mxu0 }
 0x550   : > { %v569_v39 = vpop.f32.mrb[14].mxu0 }
 0x551   : > { %v723_v40 = vpop.f32.mrb[15].mxu0 }
 0x58d   : > { %v574_v41 = vpop.permute.xlu0 %573 }
 0x58e   : > { %v584_v43 = vsel %vm128_vm1, %v844_v37, %v574_v41 }
 0x595   : > { %v578_v42 = vpop.permute.xlu1 %577 }
 0x596   : > { %v586_v44 = vsel %vm585_vm5, %v584_v43, %v578_v42 }
 0x5c1   : > { %v582_v45 = vpop.permute.xlu0 %581 }
 0x5c2   : > { %v588_v46 = vsel %vm587_vm6, %v586_v44, %v582_v45 }
 0x5c3   : > { %589 = vst [vmem:[%s114_s18] sm:$0xff] %v588_v46 }
 0x5c4 PF: > { %s11_s6 = sadd.s32 1, %s760_s6  }
 0x5c5   : > { %p8_p4 = scmp.ge.s32.totalorder %s11_s6, 4  }
 0x5c7   :  { %10 = sbr.rel (!%p8_p4) target bundleno = 1 (0x1), region = 54 }

// kernel: _lambda_.17
= control target key start
LH: loop header
LB: loop body
LE: loop exit
PB: predicated region body
PF: predicated region fallthrough
CT: control target
= control target key end

     0   :  { %s1247_s24 = smov 0   ;;  %s1249_s25 = smov 0   ;;  %s1404_s0 = inlined_call_operand.vmem [shape: f32[16,512], index: 0, kind: input, shape index: {}]   ;;  %s1405_s1 = inlined_call_operand.vmem [shape: bf16[512,128], index: 1, kind: input, shape index: {}]   ;;  %s1406_s2 = inlined_call_operand.vmem [shape: f32[1,128], index: 2, kind: input, shape index: {}]   ;;  %s1407_s3 = inlined_call_operand.vmem [shape: f32[16,128], index: 3, kind: input, shape index: {}]   ;;  %s1408_s4 = inlined_call_operand.vmem [shape: f32[1,128], index: 4, kind: input, shape index: {}]   ;;  %s1409_s5 = inlined_call_operand.vmem [shape: f32[1,128], index: 5, kind: input, shape index: {}]   ;;  %s1410_s6 = inlined_call_operand.vmem [shape: f32[16,128], index: 6, kind: output, shape index: {0}]   ;;  %s1411_s7 = inlined_call_operand.vmem [shape: f32[16,128], index: 7, kind: output, shape index: {1}]  }
   0x1   :  { %s1251_s26 = smov 0  }
   0x2 LB: > { %s37_s27 = sadd.s32 1, %s1201_s25  ;;  %p1037_p0 = scmp.ge.s32.totalorder %s1205_s26, 1  ;;  %s1205_s26 = sphi %s1251_s26, %s18_s26   ;;  %s1201_s25 = sphi %s1249_s25, %s1413_s25   ;;  %s1197_s24 = sphi %s1247_s24, %s1412_s24  }
   0x3   : > { %p39_p1 = scmp.ge.s32.totalorder %s37_s27, 2  ;;  %p324_p2 = scmp.lt.s32.totalorder %s1205_s26, 3 }
   0x5   : > { %s1415_s27 = smov (%p39_p1, %s37_s27), 0  ;;  %p325_p3 = pnand %p1037_p0, %p324_p2 }
   0x6   : > { %v1149_v0 = vld [vmem:[%s1405_s1 + $0x40] sm:$0xff] (!%p325_p3)   ;;  %v1153_v4 = vld [vmem:[%s1405_s1 + $0x48] sm:$0xff] (!%p325_p3)   ;;  %v1157_v8 = vld [vmem:[%s1405_s1 + $0x50] sm:$0xff] (!%p325_p3)   ;;  %p394_p4 = scmp.lt.s32.totalorder (!%p325_p3), %s1197_s24, 1 }
   0x7   : > { %328 = sbr.rel (%p325_p3) target bundleno = 574 (0x23e), region = 44  ;;  %v1150_v1 = vld [vmem:[%s1405_s1 + $0xc0] sm:$0xff] (!%p325_p3)   ;;  %1081 = vmatprep.subr.bf16.mxu0 (!%p325_p3), %v1149_v0  ;;  %v1154_v5 = vld [vmem:[%s1405_s1 + $0xc8] sm:$0xff] (!%p325_p3)   ;;  %v1158_v9 = vld [vmem:[%s1405_s1 + $0xd0] sm:$0xff] (!%p325_p3)  }
   0x8   : > { %v1151_v2 = vld [vmem:[%s1405_s1] sm:$0xff] (!%p325_p3)   ;;  %1103 = vmatprep.subr.bf16.mxu1 (!%p325_p3), %v1150_v1  ;;  %v1155_v6 = vld [vmem:[%s1405_s1 + $0x8] sm:$0xff] (!%p325_p3)   ;;  %v1159_v10 = vld [vmem:[%s1405_s1 + $0x10] sm:$0xff] (!%p325_p3)  }
   0x9   : > { %v1152_v3 = vld [vmem:[%s1405_s1 + $0x80] sm:$0xff] (!%p325_p3)   ;;  %1082 = vmatpush3.bf16.msra.mxu0 (!%p325_p3), %v1151_v2  ;;  %v1156_v7 = vld [vmem:[%s1405_s1 + $0x88] sm:$0xff] (!%p325_p3)   ;;  %v1160_v11 = vld [vmem:[%s1405_s1 + $0x90] sm:$0xff] (!%p325_p3)  }
   0xa   : > { %1104 = vmatpush3.bf16.msra.mxu1 (!%p325_p3), %v1152_v3  ;;  %1083 = vmatprep.subr.bf16.mxu0 (!%p325_p3), %v1153_v4  ;;  %v1161_v12 = vld [vmem:[%s1405_s1 + $0x58] sm:$0xff] (!%p325_p3)   ;;  %v1165_v16 = vld [vmem:[%s1405_s1 + $0x60] sm:$0xff] (!%p325_p3)   ;;  %v1169_v20 = vld [vmem:[%s1405_s1 + $0x68] sm:$0xff] (!%p325_p3)  }
   0xb   : > { %1105 = vmatprep.subr.bf16.mxu1 (!%p325_p3), %v1154_v5  ;;  %v1162_v13 = vld [vmem:[%s1405_s1 + $0xd8] sm:$0xff] (!%p325_p3)   ;;  %v1166_v17 = vld [vmem:[%s1405_s1 + $0xe0] sm:$0xff] (!%p325_p3)   ;;  %v1170_v21 = vld [vmem:[%s1405_s1 + $0xe8] sm:$0xff] (!%p325_p3)  }
   0xc   : > { %v1163_v14 = vld [vmem:[%s1405_s1 + $0x18] sm:$0xff] (!%p325_p3)   ;;  %v1167_v18 = vld [vmem:[%s1405_s1 + $0x20] sm:$0xff] (!%p325_p3)   ;;  %v1171_v22 = vld [vmem:[%s1405_s1 + $0x28] sm:$0xff] (!%p325_p3)  }
   0xd   : > { %1084 = vmatpush3.bf16.msra.mxu0 (!%p325_p3), %v1155_v6  ;;  %v1164_v15 = vld [vmem:[%s1405_s1 + $0x98] sm:$0xff] (!%p325_p3)   ;;  %v1168_v19 = vld [vmem:[%s1405_s1 + $0xa0] sm:$0xff] (!%p325_p3)   ;;  %v1172_v23 = vld [vmem:[%s1405_s1 + $0xa8] sm:$0xff] (!%p325_p3)  }
   0xe   : > { %1106 = vmatpush3.bf16.msra.mxu1 %v1156_v7  ;;  %1085 = vmatprep.subr.bf16.mxu0 %v1157_v8  ;;  %s1417_s24 = smov (!%p394_p4, %s1197_s24), 1  ;;  %v1173_v24 = vld [vmem:[%s1405_s1 + $0x70] sm:$0xff]   ;;  %v1177_v28 = vld [vmem:[%s1405_s1 + $0x78] sm:$0xff]   ;;  %v1075_v48 = vld [vmem:[%s1406_s2] ss:$0 sm:$0xff] }
   0xf   : > { %1107 = vmatprep.subr.bf16.mxu1 %v1158_v9  ;;  %v1174_v25 = vld [vmem:[%s1405_s1 + $0xf0] sm:$0xff]   ;;  %s1080_s21 = sshll.u32 %s1417_s24, 5  ;;  %v1178_v29 = vld [vmem:[%s1405_s1 + $0xf8] sm:$0xff]   ;;  %s1372_s16 = sshll.u32 %s1417_s24, 3  ;;  %v1076_v63 = vld [vmem:[%s1408_s4] ss:$0 sm:$0xff] }
  0x10   : > { %v1175_v26 = vld [vmem:[%s1405_s1 + $0x30] sm:$0xff]   ;;  %s401_s11 = scalar_lea.vmem %s1404_s0, %s1080_s21  ;;  %v1179_v30 = vld [vmem:[%s1405_s1 + $0x38] sm:$0xff]   ;;  %s421_s19 = scalar_lea.vmem %s1407_s3, %s1372_s16  ;;  %v1077_v1 = vld [vmem:[%s1409_s5] ss:$0 sm:$0xff] }
  0x11   : > { %1086 = vmatpush3.bf16.msra.mxu0 %v1159_v10  ;;  %v1176_v27 = vld [vmem:[%s1405_s1 + $0xb0] sm:$0xff]   ;;  %v1180_v31 = vld [vmem:[%s1405_s1 + $0xb8] sm:$0xff]   ;;  %v450_v32 = vld [vmem:[%s401_s11 + $0x8] sm:$0xff]  ;;  %s434_s23 = scalar_lea.vmem %s1410_s6, %s1372_s16 }
  0x12   : > { %1108 = vmatpush3.bf16.msra.mxu1 %v1160_v11  ;;  %1087 = vmatprep.subr.bf16.mxu0 %v1161_v12  ;;  %v452_v33 = vld [vmem:[%s401_s11 + $0x18] sm:$0xff]  ;;  %v449_v34 = vld [vmem:[%s401_s11] sm:$0xff]  ;;  %v454_v35 = vpack.c.bf16 %v450_v32, %v450_v32  ;;  %v451_v38 = vld [vmem:[%s401_s11 + $0x10] sm:$0xff]  ;;  %s441_s11 = scalar_lea.vmem %s1411_s7, %s1372_s16 }
  0x13   : > { %1109 = vmatprep.subr.bf16.mxu1 %v1162_v13  ;;  %v456_v36 = vpack.c.bf16 %v452_v33, %v452_v33  ;;  %v453_v37 = vpack.c.bf16 %v449_v34, %v449_v34  ;;  %v455_v39 = vpack.c.bf16 %v451_v38, %v451_v38  ;;  %v807_v52 = vld [vmem:[%s421_s19] sm:$0xff] }
  0x14   : > { %745 = vmatprep.mubr.bf16.mxu0 %v454_v35 }
  0x15   : > { %1088 = vmatpush3.bf16.msra.mxu0 %v1163_v14  ;;  %785 = vmatprep.mubr.bf16.mxu1 %v456_v36 }
  0x16   : > { %1110 = vmatpush3.bf16.msra.mxu1 %v1164_v15  ;;  %1089 = vmatprep.subr.bf16.mxu0 %v1165_v16 }
  0x17   : > { %1111 = vmatprep.subr.bf16.mxu1 %v1166_v17 }
  0x19   : > { %1090 = vmatpush3.bf16.msra.mxu0 %v1167_v18 }
  0x1a   : > { %1112 = vmatpush3.bf16.msra.mxu1 %v1168_v19  ;;  %1091 = vmatprep.subr.bf16.mxu0 %v1169_v20 }
  0x1b   : > { %1113 = vmatprep.subr.bf16.mxu1 %v1170_v21 }
  0x1d   : > { %1092 = vmatpush3.bf16.msra.mxu0 %v1171_v22 }
  0x1e   : > { %1114 = vmatpush3.bf16.msra.mxu1 %v1172_v23  ;;  %1093 = vmatprep.subr.bf16.mxu0 %v1173_v24 }
  0x1f   : > { %1115 = vmatprep.subr.bf16.mxu1 %v1174_v25 }
  0x21   : > { %1094 = vmatpush3.bf16.msra.mxu0 %v1175_v26 }
  0x22   : > { %1116 = vmatpush3.bf16.msra.mxu1 %v1176_v27  ;;  %1095 = vmatprep.subr.bf16.mxu0 %v1177_v28 }
  0x23   : > { %1117 = vmatprep.subr.bf16.mxu1 %v1178_v29 }
  0x25   : > { %1096 = vmatpush3.bf16.msra.mxu0 %v1179_v30 }
  0x26   : > { %1118 = vmatpush3.bf16.msra.mxu1 %v1180_v31 }
  0x28   : > { %746 = vmatmul.mubr.bf16.vlgmr.msra.gmra.mrb[0].mxu0 %v453_v37 }
  0x29   : > { %786 = vmatmul.mubr.bf16.vlgmr.msra.gmra.mrb[0].mxu1 %v455_v39 }
  0xfb   : > { %v1097_v40 = vpop.f32.mrb[0].mxu0 }
  0xfc   : > { %v1119_v41 = vpop.f32.mrb[0].mxu1  ;;  %v1098_v42 = vpop.f32.mrb[1].mxu0 }
  0xfd   : > { %v1120_v43 = vpop.f32.mrb[1].mxu1  ;;  %v1099_v44 = vadd.f32 %v1098_v42, %v1097_v40  ;;  %v1100_v46 = vpop.f32.mrb[2].mxu0 }
  0xfe   : > { %v1121_v45 = vadd.f32 %v1120_v43, %v1119_v41  ;;  %v1122_v47 = vpop.f32.mrb[2].mxu1  ;;  %v1101_v49 = vpop.f32.mrb[3].mxu0 }
  0xff   : > { %v1123_v50 = vpop.f32.mrb[3].mxu1 }
 0x100   : > { %v788_v51 = vadd.f32 %v1121_v45, %v1099_v44 }
 0x102   : > { %v806_v53 = vadd.f32 %v1075_v48, %v788_v51 }
 0x104   : > { %v808_v54 = vadd.f32 %v807_v52, %v806_v53 }
 0x106   : > { %810 = vadd.xlane.f32.xlu0 %v808_v54  ;;  %809 = vst [vmem:[%s434_s23] sm:$0xff] %v808_v54 }
 0x193   : > { %v811_v55 = vpop.xlane.xlu0 %810 }
 0x194   : > { %v812_v56 = vmul.f32 0.0078125, %v811_v55 }
 0x196   : > { %v813_v57 = vsub.f32 %v808_v54, %v812_v56 }
 0x198   : > { %v814_v58 = vmul.f32 %v813_v57, %v813_v57 }
 0x19a   : > { %815 = vadd.xlane.f32.xlu0 %v814_v58 }
 0x227   : > { %v816_v59 = vpop.xlane.xlu0 %815 }
 0x228   : > { %v817_v60 = vmul.f32 0.0078125, %v816_v59 }
 0x22a   : > { %v818_v61 = vadd.f32 1e-05, %v817_v60 }
 0x22c   : > { %1181 = vrsqrt.f32 %v818_v61 }
 0x236   : > { %v1182_v62 = vpop.eup %1181 }
 0x237   : > { %v820_v0 = vmul.f32 %v1182_v62, %v813_v57 }
 0x239   : > { %v828_v2 = vmul.f32 %v1076_v63, %v820_v0 }
 0x23b   : > { %v836_v3 = vadd.f32 %v1077_v1, %v828_v2 }
 0x23d   : > { %837 = vst [vmem:[%s441_s11] sm:$0xff] %v836_v3 }
 0x23e PF: > { %s18_s26 = sadd.s32 1, %s1205_s26   ;;  %s1412_s24 = smov %s1201_s25 }
 0x23f   : > { %p15_p5 = scmp.ge.s32.totalorder %s18_s26, 4   ;;  %s1413_s25 = smov %s1415_s27 }
 0x241   :  { %17 = sbr.rel (!%p15_p5) target bundleno = 2 (0x2), region = 109 }

// kernel: _lambda_.16
= control target key start
LH: loop header
LB: loop body
LE: loop exit
PB: predicated region body
PF: predicated region fallthrough
CT: control target
= control target key end

     0   :  { %s930_s12 = smov 0   ;;  %s932_s13 = smov 0   ;;  %s1070_s0 = inlined_call_operand.vmem [shape: f32[16,128], index: 0, kind: input, shape index: {}]   ;;  %s1071_s1 = inlined_call_operand.vmem [shape: bf16[128,512], index: 1, kind: input, shape index: {}]   ;;  %s1072_s2 = inlined_call_operand.vmem [shape: f32[1,512], index: 2, kind: input, shape index: {}]   ;;  %s1073_s3 = inlined_call_operand.vmem [shape: f32[16,512], index: 3, kind: output, shape index: {}]  }
   0x1   :  { %s934_s14 = smov 0  }
   0x2 LB: > { %s32_s15 = sadd.s32 1, %s903_s13  ;;  %p765_p0 = scmp.ge.s32.totalorder %s907_s14, 1  ;;  %s907_s14 = sphi %s934_s14, %s13_s14   ;;  %s903_s13 = sphi %s932_s13, %s1075_s13   ;;  %s899_s12 = sphi %s930_s12, %s1074_s12  }
   0x3   : > { %p34_p1 = scmp.ge.s32.totalorder %s32_s15, 2  ;;  %p191_p2 = scmp.lt.s32.totalorder %s907_s14, 3 }
   0x5   : > { %s1077_s15 = smov (%p34_p1, %s32_s15), 0  ;;  %p192_p3 = pnand %p765_p0, %p191_p2 }
   0x6   : > { %v829_v0 = vld [vmem:[%s1071_s1 + $0x4] ss:$16 sps:$4 sm:$0xff] (!%p192_p3)   ;;  %v831_v1 = vld [vmem:[%s1071_s1 + $0xc] ss:$16 sps:$4 sm:$0xff] (!%p192_p3)   ;;  %v909_v2 = vmov (!%p192_p3), 0   ;;  %p235_p4 = scmp.lt.s32.totalorder (!%p192_p3), %s899_s12, 1  ;;  %v575_v35 = vlaneseq (!%p192_p3) }
   0x7   : > { %195 = sbr.rel (%p192_p3) target bundleno = 283 (0x11b), region = 32  ;;  %508 = vmatprep.mubr.bf16.mxu0 (!%p192_p3), %v909_v2  ;;  %549 = vmatprep.mubr.bf16.mxu1 (!%p192_p3), %v909_v2  ;;  %v833_v3 = vld [vmem:[%s1071_s1] ss:$16 sps:$4 sm:$0xff] (!%p192_p3)   ;;  %v834_v4 = vld [vmem:[%s1071_s1 + $0x8] ss:$16 sps:$4 sm:$0xff] (!%p192_p3)  }
   0x8   : > { %476 = vmatprep.subr.bf16.mxu0 (!%p192_p3), %v829_v0  ;;  %517 = vmatprep.subr.bf16.mxu1 (!%p192_p3), %v831_v1  ;;  %v835_v5 = vld [vmem:[%s1071_s1 + $0x24] ss:$16 sps:$4 sm:$0xff] (!%p192_p3)   ;;  %v837_v6 = vld [vmem:[%s1071_s1 + $0x2c] ss:$16 sps:$4 sm:$0xff] (!%p192_p3)   ;;  %v839_v7 = vld [vmem:[%s1071_s1 + $0x20] ss:$16 sps:$4 sm:$0xff] (!%p192_p3)  }
   0x9   : > { %477 = vmatpush1.bf16.msra.mxu0 (!%p192_p3), %v833_v3  ;;  %518 = vmatpush1.bf16.msra.mxu1 (!%p192_p3), %v834_v4  ;;  %v840_v8 = vld [vmem:[%s1071_s1 + $0x28] ss:$16 sps:$4 sm:$0xff] (!%p192_p3)   ;;  %v841_v9 = vld [vmem:[%s1071_s1 + $0x44] ss:$16 sps:$4 sm:$0xff] (!%p192_p3)   ;;  %v843_v10 = vld [vmem:[%s1071_s1 + $0x4c] ss:$16 sps:$4 sm:$0xff] (!%p192_p3)  }
   0xa   : > { %478 = vmatprep.subr.bf16.mxu0 (!%p192_p3), %v835_v5  ;;  %519 = vmatprep.subr.bf16.mxu1 (!%p192_p3), %v837_v6  ;;  %v845_v11 = vld [vmem:[%s1071_s1 + $0x40] ss:$16 sps:$4 sm:$0xff] (!%p192_p3)   ;;  %v846_v12 = vld [vmem:[%s1071_s1 + $0x48] ss:$16 sps:$4 sm:$0xff] (!%p192_p3)   ;;  %v847_v13 = vld [vmem:[%s1071_s1 + $0x64] ss:$16 sps:$4 sm:$0xff] (!%p192_p3)  }
   0xb   : > { %v849_v14 = vld [vmem:[%s1071_s1 + $0x6c] ss:$16 sps:$4 sm:$0xff] (!%p192_p3)   ;;  %v851_v15 = vld [vmem:[%s1071_s1 + $0x60] ss:$16 sps:$4 sm:$0xff] (!%p192_p3)   ;;  %v852_v16 = vld [vmem:[%s1071_s1 + $0x68] ss:$16 sps:$4 sm:$0xff] (!%p192_p3)  }
   0xc   : > { %v853_v17 = vld [vmem:[%s1071_s1 + $0x84] ss:$16 sps:$4 sm:$0xff] (!%p192_p3)   ;;  %v855_v18 = vld [vmem:[%s1071_s1 + $0x8c] ss:$16 sps:$4 sm:$0xff] (!%p192_p3)   ;;  %v857_v19 = vld [vmem:[%s1071_s1 + $0x80] ss:$16 sps:$4 sm:$0xff] (!%p192_p3)  }
   0xd   : > { %479 = vmatpush1.bf16.msra.mxu0 (!%p192_p3), %v839_v7  ;;  %520 = vmatpush1.bf16.msra.mxu1 (!%p192_p3), %v840_v8  ;;  %v858_v20 = vld [vmem:[%s1071_s1 + $0x88] ss:$16 sps:$4 sm:$0xff] (!%p192_p3)   ;;  %v859_v21 = vld [vmem:[%s1071_s1 + $0xa4] ss:$16 sps:$4 sm:$0xff] (!%p192_p3)   ;;  %v861_v22 = vld [vmem:[%s1071_s1 + $0xac] ss:$16 sps:$4 sm:$0xff] (!%p192_p3)  }
   0xe   : > { %480 = vmatprep.subr.bf16.mxu0 %v841_v9  ;;  %521 = vmatprep.subr.bf16.mxu1 %v843_v10  ;;  %s1079_s12 = smov (!%p235_p4, %s899_s12), 1  ;;  %v863_v23 = vld [vmem:[%s1071_s1 + $0xa0] ss:$16 sps:$4 sm:$0xff]   ;;  %v864_v24 = vld [vmem:[%s1071_s1 + $0xa8] ss:$16 sps:$4 sm:$0xff]   ;;  %v576_v36 = vshrl.u32 %v575_v35, 7 }
   0xf   : > { %v865_v25 = vld [vmem:[%s1071_s1 + $0xc4] ss:$16 sps:$4 sm:$0xff]   ;;  %v867_v26 = vld [vmem:[%s1071_s1 + $0xcc] ss:$16 sps:$4 sm:$0xff]   ;;  %s766_s22 = sshll.u32 %s1079_s12, 3  ;;  %s803_s17 = sshll.u32 %s1079_s12, 5 }
  0x10   : > { %v869_v27 = vld [vmem:[%s1071_s1 + $0xc0] ss:$16 sps:$4 sm:$0xff]   ;;  %v870_v28 = vld [vmem:[%s1071_s1 + $0xc8] ss:$16 sps:$4 sm:$0xff]   ;;  %v871_v29 = vld [vmem:[%s1071_s1 + $0xe4] ss:$16 sps:$4 sm:$0xff]   ;;  %s241_s6 = scalar_lea.vmem %s1070_s0, %s766_s22  ;;  %s267_s20 = scalar_lea.vmem %s1073_s3, %s803_s17 }
  0x11   : > { %481 = vmatpush1.bf16.msra.mxu0 %v845_v11  ;;  %522 = vmatpush1.bf16.msra.mxu1 %v846_v12  ;;  %v873_v30 = vld [vmem:[%s1071_s1 + $0xec] ss:$16 sps:$4 sm:$0xff]   ;;  %v875_v31 = vld [vmem:[%s1071_s1 + $0xe0] ss:$16 sps:$4 sm:$0xff]   ;;  %v876_v32 = vld [vmem:[%s1071_s1 + $0xe8] ss:$16 sps:$4 sm:$0xff]  }
  0x12   : > { %482 = vmatprep.subr.bf16.mxu0 %v847_v13  ;;  %523 = vmatprep.subr.bf16.mxu1 %v849_v14  ;;  %v282_v33 = vld [vmem:[%s241_s6] sm:$0xff]  ;;  %v577_v37 = vsub.s32 0, %v576_v36  ;;  %v585_v38 = vsub.s32 2, %v576_v36  ;;  %v581_v40 = vsub.s32 1, %v576_v36  ;;  %v589_v41 = vsub.s32 3, %v576_v36 }
  0x13   : > { %v283_v34 = vpack.c.bf16 %v282_v33, %v282_v33  ;;  %v573_v39 = vld [vmem:[%s1072_s2] sm:$0xf] }
  0x14   : > { %v578_v42 = vrot.slane %v573_v39, %v577_v37  ;;  %v586_v43 = vrot.slane %v573_v39, %v585_v38  ;;  %v582_v44 = vrot.slane %v573_v39, %v581_v40  ;;  %v590_v45 = vrot.slane %v573_v39, %v589_v41 }
  0x15   : > { %483 = vmatpush1.bf16.msra.mxu0 %v851_v15  ;;  %524 = vmatpush1.bf16.msra.mxu1 %v852_v16 }
  0x16   : > { %484 = vmatprep.subr.bf16.mxu0 %v853_v17  ;;  %525 = vmatprep.subr.bf16.mxu1 %v855_v18 }
  0x19   : > { %485 = vmatpush1.bf16.msra.mxu0 %v857_v19  ;;  %526 = vmatpush1.bf16.msra.mxu1 %v858_v20 }
  0x1a   : > { %486 = vmatprep.subr.bf16.mxu0 %v859_v21  ;;  %527 = vmatprep.subr.bf16.mxu1 %v861_v22 }
  0x1d   : > { %487 = vmatpush1.bf16.msra.mxu0 %v863_v23  ;;  %528 = vmatpush1.bf16.msra.mxu1 %v864_v24 }
  0x1e   : > { %488 = vmatprep.subr.bf16.mxu0 %v865_v25  ;;  %529 = vmatprep.subr.bf16.mxu1 %v867_v26 }
  0x21   : > { %489 = vmatpush1.bf16.msra.mxu0 %v869_v27  ;;  %530 = vmatpush1.bf16.msra.mxu1 %v870_v28 }
  0x22   : > { %490 = vmatprep.subr.bf16.mxu0 %v871_v29  ;;  %531 = vmatprep.subr.bf16.mxu1 %v873_v30 }
  0x25   : > { %491 = vmatpush1.bf16.msra.mxu0 %v875_v31  ;;  %532 = vmatpush1.bf16.msra.mxu1 %v876_v32 }
  0x28   : > { %509 = vmatmul.mubr.bf16.vlgmr.msra.gmra.mrb[0].mxu0 %v283_v34  ;;  %550 = vmatmul.mubr.bf16.vlgmr.msra.gmra.mrb[0].mxu1 %v283_v34 }
  0xfb   : > { %v510_v46 = vpop.f32.mrb[0].mxu0  ;;  %v551_v47 = vpop.f32.mrb[0].mxu1 }
  0xfc   : > { %v595_v48 = vadd.f32 %v578_v42, %v510_v46  ;;  %v597_v49 = vadd.f32 %v586_v43, %v551_v47  ;;  %v512_v50 = vpop.f32.mrb[1].mxu0  ;;  %v553_v51 = vpop.f32.mrb[1].mxu1 }
  0xfd   : > { %v596_v52 = vadd.f32 %v582_v44, %v512_v50  ;;  %v598_v53 = vadd.f32 %v590_v45, %v553_v51  ;;  %v514_v54 = vpop.f32.mrb[2].mxu0  ;;  %v555_v55 = vpop.f32.mrb[2].mxu1 }
  0xfe   : > { %v603_v56 = vmul.f32 0.044715, %v595_v48  ;;  %v605_v57 = vmul.f32 0.044715, %v597_v49  ;;  %v515_v62 = vpop.f32.mrb[3].mxu0  ;;  %v556_v63 = vpop.f32.mrb[3].mxu1 }
  0xff   : > { %v604_v58 = vmul.f32 0.044715, %v596_v52  ;;  %v606_v59 = vmul.f32 0.044715, %v598_v53  ;;  %v599_v16 = vmul.f32 0.5, %v595_v48  ;;  %v601_v19 = vmul.f32 0.5, %v597_v49 }
 0x100   : > { %v607_v60 = vmul.f32 %v603_v56, %v595_v48  ;;  %v609_v61 = vmul.f32 %v605_v57, %v597_v49  ;;  %v600_v23 = vmul.f32 0.5, %v596_v52  ;;  %v602_v26 = vmul.f32 0.5, %v598_v53 }
 0x101   : > { %v608_v0 = vmul.f32 %v604_v58, %v596_v52  ;;  %v610_v1 = vmul.f32 %v606_v59, %v598_v53 }
 0x102   : > { %v611_v2 = vmul.f32 %v607_v60, %v595_v48  ;;  %v613_v3 = vmul.f32 %v609_v61, %v597_v49 }
 0x103   : > { %v612_v4 = vmul.f32 %v608_v0, %v596_v52  ;;  %v614_v5 = vmul.f32 %v610_v1, %v598_v53 }
 0x104   : > { %v615_v6 = vadd.f32 %v611_v2, %v595_v48  ;;  %v617_v7 = vadd.f32 %v613_v3, %v597_v49 }
 0x105   : > { %v616_v8 = vadd.f32 %v612_v4, %v596_v52  ;;  %v618_v9 = vadd.f32 %v614_v5, %v598_v53 }
 0x106   : > { %v619_v10 = vmul.f32 0.7978846, %v615_v6  ;;  %v621_v11 = vmul.f32 0.7978846, %v617_v7 }
 0x107   : > { %v620_v12 = vmul.f32 0.7978846, %v616_v8  ;;  %v622_v13 = vmul.f32 0.7978846, %v618_v9 }
 0x108   : > { %877 = vtanh.f32 %v619_v10 }
 0x109   : > { %879 = vtanh.f32 %v621_v11 }
 0x10a   : > { %881 = vtanh.f32 %v620_v12 }
 0x10b   : > { %883 = vtanh.f32 %v622_v13 }
 0x112   : > { %v878_v14 = vpop.eup %877 }
 0x113   : > { %v880_v15 = vpop.eup %879  ;;  %v627_v17 = vadd.f32 1.0, %v878_v14 }
 0x114   : > { %v882_v18 = vpop.eup %881  ;;  %v629_v20 = vadd.f32 1.0, %v880_v15 }
 0x115   : > { %v884_v21 = vpop.eup %883  ;;  %v631_v22 = vmul.f32 %v627_v17, %v599_v16  ;;  %v628_v24 = vadd.f32 1.0, %v882_v18 }
 0x116   : > { %v633_v25 = vmul.f32 %v629_v20, %v601_v19  ;;  %v630_v27 = vadd.f32 1.0, %v884_v21 }
 0x117   : > { %635 = vst [vmem:[%s267_s20] sm:$0xff] %v631_v22  ;;  %v632_v28 = vmul.f32 %v628_v24, %v600_v23 }
 0x118   : > { %637 = vst [vmem:[%s267_s20 + $0x10] sm:$0xff] %v633_v25  ;;  %v634_v29 = vmul.f32 %v630_v27, %v602_v26 }
 0x119   : > { %636 = vst [vmem:[%s267_s20 + $0x8] sm:$0xff] %v632_v28 }
 0x11a   : > { %638 = vst [vmem:[%s267_s20 + $0x18] sm:$0xff] %v634_v29 }
 0x11b PF: > { %s13_s14 = sadd.s32 1, %s907_s14   ;;  %s1074_s12 = smov %s903_s13 }
 0x11c   : > { %p10_p5 = scmp.ge.s32.totalorder %s13_s14, 4   ;;  %s1075_s13 = smov %s1077_s15 }
 0x11e   :  { %12 = sbr.rel (!%p10_p5) target bundleno = 2 (0x2), region = 76 }

// kernel: _lambda_.22
= control target key start
LH: loop header
LB: loop body
LE: loop exit
PB: predicated region body
PF: predicated region fallthrough
CT: control target
= control target key end

     0   :  { %13 = vsyncpa [#allocation4], 0  ;;  %s1567_s0 = inlined_call_operand.vmem [shape: f32[16,512], index: 0, kind: input, shape index: {}]   ;;  %s1568_s1 = inlined_call_operand.vmem [shape: bf16[512,128], index: 1, kind: input, shape index: {}]   ;;  %s1569_s2 = inlined_call_operand.vmem [shape: f32[1,128], index: 2, kind: input, shape index: {}]   ;;  %s1570_s3 = inlined_call_operand.vmem [shape: f32[16,128], index: 3, kind: input, shape index: {}]   ;;  %s1571_s4 = inlined_call_operand.vmem [shape: f32[1,128], index: 4, kind: input, shape index: {}]   ;;  %s1572_s5 = inlined_call_operand.vmem [shape: f32[1,128], index: 5, kind: input, shape index: {}]   ;;  %s1573_s6 = inlined_call_operand.hbm [shape: f32[16,128], index: 6, kind: output, shape index: {0}]   ;;  %s1574_s7 = inlined_call_operand.vmem [shape: f32[16,128], index: 7, kind: output, shape index: {1}]  }
   0x1   :  { %15 = vsyncpa [#allocation4 + $0x1], 0  ;;  %s1342_s24 = smov 0   ;;  %s1344_s25 = smov 0  }
   0x2   :  { %s1346_s26 = smov 0   ;;  %s1348_s27 = smov 0  }
   0x3   :  { %s1350_s28 = smov 0   ;;  %s1352_s29 = smov 0  }
   0x4 LB: > { %s1034_s30 = sadd.s32 4294967295, %s1299_s29   ;;  %s1035_s8 = sadd.s32 4294967294, %s1299_s29   ;;  %s1299_s29 = sphi %s1352_s29, %s21_s29   ;;  %s1295_s28 = sphi %s1350_s28, %s1583_s28   ;;  %s1291_s27 = sphi %s1348_s27, %s1582_s27   ;;  %s1287_s26 = sphi %s1346_s26, %s1581_s26   ;;  %s1283_s25 = sphi %s1344_s25, %s1580_s25   ;;  %s1279_s24 = sphi %s1342_s24, %s1579_s24  }
   0x5   : > { %s40_s9 = sadd.s32 1, %s1295_s28  ;;  %s211_s10 = sadd.s32 1, %s1287_s26 }
   0x6   : > { %p42_p0 = scmp.ge.s32.totalorder %s40_s9, 2  ;;  %p221_p1 = scmp.ne.s32.totalorder %s1287_s26, %s1283_s25 }
   0x7   : > { %p222_p2 = scmp.eq.s32.totalorder %s1034_s30, 1  ;;  %p227_p3 = scmp.ne.s32.totalorder %s1283_s25, %s1279_s24 }
   0x8   : > { %s1585_s9 = smov (%p42_p0, %s40_s9), 0  ;;  %p228_p5 = scmp.eq.s32.totalorder %s1035_s8, 1 }
   0x9   : > { %p1382_p4 = por %p222_p2, %p221_p1  ;;  %s206_s12 = ssub.s32 %s1295_s28, %s1585_s9 }
   0xa   : > { %p1042_p6 = scmp.ge.s32.totalorder %s1299_s29, 1  ;;  %p209_p7 = scmp.eq.s32.totalorder %s206_s12, 0 }
   0xb   : > { %p1389_p8 = por %p228_p5, %p227_p3  ;;  %p327_p9 = scmp.lt.s32.totalorder %s1299_s29, 3 }
   0xc   : > { %s1395_s14 = scalar_select %p209_p7, %s1287_s26, %s211_s10  }
   0xd   : > { %p328_p10 = pnand %p1042_p6, %p327_p9 }
   0xe   : > { %v1187_v0 = vld [vmem:[%s1568_s1 + $0x40] sm:$0xff] (!%p328_p10)   ;;  %v1191_v4 = vld [vmem:[%s1568_s1 + $0x48] sm:$0xff] (!%p328_p10)   ;;  %v1195_v8 = vld [vmem:[%s1568_s1 + $0x50] sm:$0xff] (!%p328_p10)   ;;  %p395_p11 = scmp.lt.s32.totalorder (!%p328_p10), %s1291_s27, 1  ;;  %s382_s21 = sand.u32 (!%p328_p10), 1, %s1283_s25  }
   0xf   : > { %331 = sbr.rel (%p328_p10) target bundleno = 582 (0x246), region = 44  ;;  %v1188_v1 = vld [vmem:[%s1568_s1 + $0xc0] sm:$0xff] (!%p328_p10)   ;;  %1088 = vmatprep.subr.bf16.mxu0 (!%p328_p10), %v1187_v0  ;;  %v1192_v5 = vld [vmem:[%s1568_s1 + $0xc8] sm:$0xff] (!%p328_p10)   ;;  %v1196_v9 = vld [vmem:[%s1568_s1 + $0xd0] sm:$0xff] (!%p328_p10)   ;;  %s1084_s17 = sshll.u32 (!%p328_p10), %s1291_s27, 7 }
  0x10   : > { %v1189_v2 = vld [vmem:[%s1568_s1] sm:$0xff] (!%p328_p10)   ;;  %1110 = vmatprep.subr.bf16.mxu1 (!%p328_p10), %v1188_v1  ;;  %v1193_v6 = vld [vmem:[%s1568_s1 + $0x8] sm:$0xff] (!%p328_p10)   ;;  %v1197_v10 = vld [vmem:[%s1568_s1 + $0x10] sm:$0xff] (!%p328_p10)   ;;  %s1515_s30 = scalar_lea.hbm (!%p328_p10), %s1573_s6, %s1084_s17  ;;  %s1301_s12 = smov (!%p328_p10), [#allocation3]  }
  0x11   : > { %v1190_v3 = vld [vmem:[%s1568_s1 + $0x80] sm:$0xff] (!%p328_p10)   ;;  %1089 = vmatpush3.bf16.msra.mxu0 (!%p328_p10), %v1189_v2  ;;  %v1194_v7 = vld [vmem:[%s1568_s1 + $0x88] sm:$0xff] (!%p328_p10)   ;;  %v1198_v11 = vld [vmem:[%s1568_s1 + $0x90] sm:$0xff] (!%p328_p10)  }
  0x12   : > { %1111 = vmatpush3.bf16.msra.mxu1 (!%p328_p10), %v1190_v3  ;;  %1090 = vmatprep.subr.bf16.mxu0 (!%p328_p10), %v1191_v4  ;;  %v1199_v12 = vld [vmem:[%s1568_s1 + $0x58] sm:$0xff] (!%p328_p10)   ;;  %v1203_v16 = vld [vmem:[%s1568_s1 + $0x60] sm:$0xff] (!%p328_p10)   ;;  %v1207_v20 = vld [vmem:[%s1568_s1 + $0x68] sm:$0xff] (!%p328_p10)  }
  0x13   : > { %1112 = vmatprep.subr.bf16.mxu1 (!%p328_p10), %v1192_v5  ;;  %v1200_v13 = vld [vmem:[%s1568_s1 + $0xd8] sm:$0xff] (!%p328_p10)   ;;  %v1204_v17 = vld [vmem:[%s1568_s1 + $0xe0] sm:$0xff] (!%p328_p10)   ;;  %v1208_v21 = vld [vmem:[%s1568_s1 + $0xe8] sm:$0xff] (!%p328_p10)  }
  0x14   : > { %v1201_v14 = vld [vmem:[%s1568_s1 + $0x18] sm:$0xff] (!%p328_p10)   ;;  %v1205_v18 = vld [vmem:[%s1568_s1 + $0x20] sm:$0xff] (!%p328_p10)   ;;  %v1209_v22 = vld [vmem:[%s1568_s1 + $0x28] sm:$0xff] (!%p328_p10)  }
  0x15   : > { %1091 = vmatpush3.bf16.msra.mxu0 (!%p328_p10), %v1193_v6  ;;  %v1202_v15 = vld [vmem:[%s1568_s1 + $0x98] sm:$0xff] (!%p328_p10)   ;;  %v1206_v19 = vld [vmem:[%s1568_s1 + $0xa0] sm:$0xff] (!%p328_p10)   ;;  %v1210_v23 = vld [vmem:[%s1568_s1 + $0xa8] sm:$0xff] (!%p328_p10)  }
  0x16   : > { %1113 = vmatpush3.bf16.msra.mxu1 %v1194_v7  ;;  %1092 = vmatprep.subr.bf16.mxu0 %v1195_v8  ;;  %s1468_s22 = scalar_select %p395_p11, %s1291_s27, 1  ;;  %v1211_v24 = vld [vmem:[%s1568_s1 + $0x70] sm:$0xff]   ;;  %v1215_v28 = vld [vmem:[%s1568_s1 + $0x78] sm:$0xff]   ;;  %v1080_v48 = vld [vmem:[%s1569_s2] ss:$0 sm:$0xff] }
  0x17   : > { %1114 = vmatprep.subr.bf16.mxu1 %v1196_v9  ;;  %v1212_v25 = vld [vmem:[%s1568_s1 + $0xf0] sm:$0xff]   ;;  %v1216_v29 = vld [vmem:[%s1568_s1 + $0xf8] sm:$0xff]  }
  0x18   : > { %v1213_v26 = vld [vmem:[%s1568_s1 + $0x30] sm:$0xff]   ;;  %s1087_s18 = sshll.u32 %s1468_s22, 5  ;;  %v1217_v30 = vld [vmem:[%s1568_s1 + $0x38] sm:$0xff]  }
  0x19   : > { %1093 = vmatpush3.bf16.msra.mxu0 %v1197_v10  ;;  %v1214_v27 = vld [vmem:[%s1568_s1 + $0xb0] sm:$0xff]   ;;  %s402_s15 = scalar_lea.vmem %s1567_s0, %s1087_s18  ;;  %v1218_v31 = vld [vmem:[%s1568_s1 + $0xb8] sm:$0xff]   ;;  %s1575_s18 = sshll.u32 %s1468_s22, 3 }
  0x1a   : > { %1115 = vmatpush3.bf16.msra.mxu1 %v1198_v11  ;;  %1094 = vmatprep.subr.bf16.mxu0 %v1199_v12  ;;  %v444_v32 = vld [vmem:[%s402_s15 + $0x8] sm:$0xff]  ;;  %v446_v33 = vld [vmem:[%s402_s15 + $0x18] sm:$0xff]  ;;  %v443_v34 = vld [vmem:[%s402_s15] sm:$0xff]  ;;  %s422_s8 = scalar_lea.vmem %s1570_s3, %s1575_s18 }
  0x1b   : > { %1116 = vmatprep.subr.bf16.mxu1 %v1200_v13  ;;  %v448_v35 = vpack.c.bf16 %v444_v32, %v444_v32  ;;  %v450_v36 = vpack.c.bf16 %v446_v33, %v446_v33  ;;  %v447_v37 = vpack.c.bf16 %v443_v34, %v443_v34  ;;  %v445_v38 = vld [vmem:[%s402_s15 + $0x10] sm:$0xff]  ;;  %s1043_s15 = sshll.u32 %s382_s21, 3  ;;  %v801_v52 = vld [vmem:[%s422_s8] sm:$0xff]  ;;  %s833_s8 = scalar_lea.sflag [#allocation4], %s382_s21 }
  0x1c   : > { %v449_v39 = vpack.c.bf16 %v445_v38, %v445_v38  ;;  %s384_s16 = scalar_lea.vmem [#allocation3], %s1043_s15  ;;  %s1225_s15 = sshll.u32 %s1301_s12, 4  ;;  %s1226_s15 = int_to_ptr.vmem [resolvable:$false] %s1225_s15 }
  0x1d   : > { %1095 = vmatpush3.bf16.msra.mxu0 %v1201_v14  ;;  %739 = vmatprep.mubr.bf16.mxu0 %v448_v35  ;;  %s854_s19 = sshll.u32 %s384_s16, 4  ;;  %s1227_s18 = scalar_lea.vmem %s1226_s15, 256  ;;  %s855_s19 = int_to_ptr.vmem [resolvable:$true] %s854_s19 }
  0x1e   : > { %1117 = vmatpush3.bf16.msra.mxu1 %v1202_v15  ;;  %1096 = vmatprep.subr.bf16.mxu0 %v1203_v16  ;;  %s1221_s10 = scalar_lea.vmem %s855_s19, 128  ;;  %p1228_p1 = scmp.lt.s32.totalorder %s855_s19, %s1226_s15 }
  0x1f   : > { %1118 = vmatprep.subr.bf16.mxu1 %v1204_v17  ;;  %779 = vmatprep.mubr.bf16.mxu1 %v450_v36  ;;  %p1222_p12 = scmp.ne.s32.totalorder %s855_s19, %s1221_s10  ;;  %p1229_p2 = scmp.lt.s32.totalorder %s1227_s18, %s1221_s10 }
  0x21   : > { %1097 = vmatpush3.bf16.msra.mxu0 %v1205_v18  ;;  %p1223_p13 = pnand %p1222_p12, %p1382_p4  ;;  %p1230_p3 = por %p1229_p2, %p1228_p1 }
  0x22   : > { %1119 = vmatpush3.bf16.msra.mxu1 %v1206_v19  ;;  %1098 = vmatprep.subr.bf16.mxu0 %v1207_v20 }
  0x23   : > { %1120 = vmatprep.subr.bf16.mxu1 %v1208_v21  ;;  %p1224_p0 = pneg %p1223_p13 }
  0x25   : > { %1099 = vmatpush3.bf16.msra.mxu0 %v1209_v22  ;;  %p1231_p5 = pnand %p1230_p3, %p1224_p0 }
  0x26   : > { %1121 = vmatpush3.bf16.msra.mxu1 %v1210_v23  ;;  %1100 = vmatprep.subr.bf16.mxu0 %v1211_v24 }
  0x27   : > { %1122 = vmatprep.subr.bf16.mxu1 %v1212_v25 }
  0x29   : > { %1101 = vmatpush3.bf16.msra.mxu0 %v1213_v26 }
  0x2a   : > { %1123 = vmatpush3.bf16.msra.mxu1 %v1214_v27  ;;  %1102 = vmatprep.subr.bf16.mxu0 %v1215_v28 }
  0x2b   : > { %1124 = vmatprep.subr.bf16.mxu1 %v1216_v29 }
  0x2d   : > { %1103 = vmatpush3.bf16.msra.mxu0 %v1217_v30 }
  0x2e   : > { %1125 = vmatpush3.bf16.msra.mxu1 %v1218_v31 }
  0x30   : > { %740 = vmatmul.mubr.bf16.vlgmr.msra.gmra.mrb[0].mxu0 %v447_v37 }
  0x31   : > { %780 = vmatmul.mubr.bf16.vlgmr.msra.gmra.mrb[0].mxu1 %v449_v39 }
 0x103   : > { %v1104_v40 = vpop.f32.mrb[0].mxu0 }
 0x104   : > { %v1126_v41 = vpop.f32.mrb[0].mxu1  ;;  %v1105_v42 = vpop.f32.mrb[1].mxu0 }
 0x105   : > { %v1127_v43 = vpop.f32.mrb[1].mxu1  ;;  %v1106_v44 = vadd.f32 %v1105_v42, %v1104_v40  ;;  %v1107_v46 = vpop.f32.mrb[2].mxu0 }
 0x106   : > { %v1128_v45 = vadd.f32 %v1127_v43, %v1126_v41  ;;  %v1129_v47 = vpop.f32.mrb[2].mxu1  ;;  %v1108_v49 = vpop.f32.mrb[3].mxu0 }
 0x107   : > { %v1130_v50 = vpop.f32.mrb[3].mxu1 }
 0x108   : > { %v782_v51 = vadd.f32 %v1128_v45, %v1106_v44 }
 0x10a   : > { %v800_v53 = vadd.f32 %v1080_v48, %v782_v51 }
 0x10c   : > { %v802_v54 = vadd.f32 %v801_v52, %v800_v53 }
 0x10e   : > { %804 = vadd.xlane.f32.xlu0 %v802_v54  ;;  %803 = vst [vmem:[%s384_s16] sm:$0xff] %v802_v54 }
 0x19b   : > { %v805_v55 = vpop.xlane.xlu0 %804 }
 0x19c   : > { %v806_v56 = vmul.f32 0.0078125, %v805_v55 }
 0x19e   : > { %v807_v57 = vsub.f32 %v802_v54, %v806_v56 }
 0x1a0   : > { %v808_v58 = vmul.f32 %v807_v57, %v807_v57 }
 0x1a2   : > { %809 = vadd.xlane.f32.xlu0 %v808_v58 }
 0x1a3   : > { %1234 = shalt.err (!%p1231_p5)
}
 0x1a4   : > { %s1235_s27 = scalar_lea.hbm %s1515_s30, 128  ;;  %s1239_s17 = scalar_lea.hbm %s1573_s6, 256 }
 0x1a5   : > { %p1236_p6 = scmp.ne.s32.totalorder %s1515_s30, %s1235_s27  ;;  %p1240_p10 = scmp.lt.u32.totalorder %s1515_s30, %s1573_s6 }
 0x1a6   : > { %p1241_p11 = scmp.lt.u32.totalorder %s1239_s17, %s1235_s27  ;;  %p1243_p13 = scmp.lt.u32.totalorder %s1235_s27, %s1515_s30 }
 0x1a7   : > { %p1237_p7 = pnand %p1236_p6, %p1382_p4 }
 0x1a8   : > { %p1242_p12 = por %p1241_p11, %p1240_p10 }
 0x1a9   : > { %p1238_p9 = pneg %p1237_p7 }
 0x1aa   : > { %p1244_p0 = por %p1243_p13, %p1242_p12 }
 0x1ac   : > { %p1245_p1 = pnand %p1244_p0, %p1238_p9 }
 0x1ae   : > { %1248 = shalt.err (!%p1245_p1)
}
 0x1af   : > { %1132 = dma.vmem_to_hbm [thread:$0]  (%p1382_p4), %s855_s19, 128, %s1515_s30, %s833_s8   ;;  %v1081_v63 = vld [vmem:[%s1571_s4] ss:$0 sm:$0xff] }
 0x1b0   : > { %v1082_v1 = vld [vmem:[%s1572_s5] ss:$0 sm:$0xff]  ;;  %s1578_s27 = sshll.u32 %s1468_s22, 3 }
 0x1b1   : > { %s435_s19 = scalar_lea.vmem %s1574_s7, %s1578_s27 }
 0x22f   : > { %v810_v59 = vpop.xlane.xlu0 %809 }
 0x230   : > { %v811_v60 = vmul.f32 0.0078125, %v810_v59 }
 0x232   : > { %v812_v61 = vadd.f32 1e-05, %v811_v60 }
 0x234   : > { %1219 = vrsqrt.f32 %v812_v61 }
 0x23e   : > { %v1220_v62 = vpop.eup %1219 }
 0x23f   : > { %v814_v0 = vmul.f32 %v1220_v62, %v807_v57 }
 0x241   : > { %v822_v2 = vmul.f32 %v1081_v63, %v814_v0 }
 0x243   : > { %v830_v3 = vadd.f32 %v1082_v1, %v822_v2 }
 0x245   : > { %831 = vst [vmem:[%s435_s19] sm:$0xff] %v830_v3 }
 0x246 PF: > { %p1138_p4 = scmp.ge.s32.totalorder %s1299_s29, 2  ;;  %s869_s30 = sand.u32 1, %s1279_s24  }
 0x247   : > { %s870_s8 = scalar_lea.sflag [#allocation4], %s869_s30 }
 0x248   : > { %p1135_p2 = pnand %p1138_p4, %p1389_p8 }
 0x24a   : > { %1274 = dma.done.wait (!%p1135_p2), %s870_s8, 128  }
 0x24b   : > { %1276 = vsyncadd (!%p1135_p2), %s870_s8, 4294967168  ;;  %s21_s29 = sadd.s32 1, %s1299_s29   ;;  %s1579_s24 = smov %s1283_s25 }
 0x24c   : > { %p18_p3 = scmp.ge.s32.totalorder %s21_s29, 4   ;;  %s1580_s25 = smov %s1287_s26 }
 0x24d   : > { %s1581_s26 = smov %s1395_s14  ;;  %s1582_s27 = smov %s1295_s28 }
 0x24e   : > { %s1583_s28 = smov %s1585_s9  ;;  %20 = sbr.rel (!%p18_p3) target bundleno = 4 (0x4), region = 114 }
 0x255   :  { %885 = vsyncpa [#allocation4], 1 }
 0x256   :  { %887 = vsyncpa [#allocation4 + $0x1], 1 }

// kernel: _lambda_.23
= control target key start
LH: loop header
LB: loop body
LE: loop exit
PB: predicated region body
PF: predicated region fallthrough
CT: control target
= control target key end

     0   :  { %7 = vsyncpa [#allocation4], 0  ;;  %s853_s0 = inlined_call_operand.vmem [shape: f32[16,128], index: 0, kind: input, shape index: {}]   ;;  %s854_s1 = inlined_call_operand.vmem [shape: bf16[128,256], index: 1, kind: input, shape index: {}]   ;;  %s855_s2 = inlined_call_operand.hbm [shape: f32[16,256], index: 2, kind: output, shape index: {}]  }
   0x1   :  { %9 = vsyncpa [#allocation4 + $0x1], 0  ;;  %s693_s9 = smov 0   ;;  %s695_s10 = smov 0  }
   0x2   :  { %s697_s11 = smov 0   ;;  %s699_s12 = smov 0  }
   0x3   :  { %s701_s13 = smov 0   ;;  %s703_s14 = smov 0  }
   0x4 LB: > { %s486_s15 = sadd.s32 4294967295, %s674_s14   ;;  %s487_s16 = sadd.s32 4294967294, %s674_s14   ;;  %s674_s14 = sphi %s703_s14, %s15_s14   ;;  %s670_s13 = sphi %s701_s13, %s862_s13   ;;  %s666_s12 = sphi %s699_s12, %s861_s12   ;;  %s662_s11 = sphi %s697_s11, %s860_s11   ;;  %s658_s10 = sphi %s695_s10, %s859_s10   ;;  %s654_s9 = sphi %s693_s9, %s858_s9  }
   0x5   : > { %s34_s17 = sadd.s32 1, %s670_s13  ;;  %s99_s18 = sadd.s32 1, %s662_s11 }
   0x6   : > { %p36_p0 = scmp.ge.s32.totalorder %s34_s17, 2  ;;  %p109_p1 = scmp.ne.s32.totalorder %s662_s11, %s658_s10 }
   0x7   : > { %p110_p2 = scmp.eq.s32.totalorder %s486_s15, 1  ;;  %p115_p3 = scmp.ne.s32.totalorder %s658_s10, %s654_s9 }
   0x8   : > { %s864_s17 = smov (%p36_p0, %s34_s17), 0  ;;  %p116_p5 = scmp.eq.s32.totalorder %s487_s16, 1 }
   0x9   : > { %p733_p4 = por %p110_p2, %p109_p1  ;;  %s94_s20 = ssub.s32 %s670_s13, %s864_s17 }
   0xa   : > { %p491_p6 = scmp.ge.s32.totalorder %s674_s14, 1  ;;  %p97_p7 = scmp.eq.s32.totalorder %s94_s20, 0 }
   0xb   : > { %p740_p8 = por %p116_p5, %p115_p3  ;;  %p159_p9 = scmp.lt.s32.totalorder %s674_s14, 3 }
   0xc   : > { %s746_s22 = scalar_select %p97_p7, %s662_s11, %s99_s18  }
   0xd   : > { %p160_p10 = pnand %p491_p6, %p159_p9 }
   0xe   : > { %v572_v0 = vld [vmem:[%s854_s1 + $0x4] ss:$8 sps:$4 sm:$0xff] (!%p160_p10)   ;;  %v574_v1 = vld [vmem:[%s854_s1] ss:$8 sps:$4 sm:$0xff] (!%p160_p10)   ;;  %v676_v2 = vmov (!%p160_p10), 0   ;;  %p193_p11 = scmp.lt.s32.totalorder (!%p160_p10), %s666_s12, 1 }
   0xf   : > { %163 = sbr.rel (%p160_p10) target bundleno = 275 (0x113), region = 28  ;;  %352 = vmatprep.mubr.bf16.mxu0 (!%p160_p10), %v676_v2  ;;  %320 = vmatprep.subr.bf16.mxu0 (!%p160_p10), %v572_v0  ;;  %v575_v3 = vld [vmem:[%s854_s1 + $0x14] ss:$8 sps:$4 sm:$0xff] (!%p160_p10)   ;;  %v577_v4 = vld [vmem:[%s854_s1 + $0x10] ss:$8 sps:$4 sm:$0xff] (!%p160_p10)   ;;  %s190_s24 = sand.u32 (!%p160_p10), 1, %s658_s10  }
  0x10   : > { %321 = vmatpush1.bf16.msra.mxu0 (!%p160_p10), %v574_v1  ;;  %v578_v5 = vld [vmem:[%s854_s1 + $0x24] ss:$8 sps:$4 sm:$0xff] (!%p160_p10)   ;;  %v580_v6 = vld [vmem:[%s854_s1 + $0x20] ss:$8 sps:$4 sm:$0xff] (!%p160_p10)   ;;  %v581_v7 = vld [vmem:[%s854_s1 + $0x34] ss:$8 sps:$4 sm:$0xff] (!%p160_p10)  }
  0x11   : > { %322 = vmatprep.subr.bf16.mxu0 (!%p160_p10), %v575_v3  ;;  %v583_v8 = vld [vmem:[%s854_s1 + $0x30] ss:$8 sps:$4 sm:$0xff] (!%p160_p10)   ;;  %v584_v9 = vld [vmem:[%s854_s1 + $0x44] ss:$8 sps:$4 sm:$0xff] (!%p160_p10)   ;;  %v586_v10 = vld [vmem:[%s854_s1 + $0x40] ss:$8 sps:$4 sm:$0xff] (!%p160_p10)  }
  0x12   : > { %v587_v11 = vld [vmem:[%s854_s1 + $0x54] ss:$8 sps:$4 sm:$0xff] (!%p160_p10)   ;;  %v589_v12 = vld [vmem:[%s854_s1 + $0x50] ss:$8 sps:$4 sm:$0xff] (!%p160_p10)   ;;  %v590_v13 = vld [vmem:[%s854_s1 + $0x64] ss:$8 sps:$4 sm:$0xff] (!%p160_p10)  }
  0x13   : > { %v592_v14 = vld [vmem:[%s854_s1 + $0x60] ss:$8 sps:$4 sm:$0xff] (!%p160_p10)   ;;  %v593_v15 = vld [vmem:[%s854_s1 + $0x74] ss:$8 sps:$4 sm:$0xff] (!%p160_p10)   ;;  %v595_v16 = vld [vmem:[%s854_s1 + $0x70] ss:$8 sps:$4 sm:$0xff] (!%p160_p10)  }
  0x14   : > { %323 = vmatpush1.bf16.msra.mxu0 (!%p160_p10), %v577_v4  ;;  %s492_s25 = sshll.u32 (!%p160_p10), %s190_s24, 4  ;;  %s515_s28 = sshll.u32 (!%p160_p10), %s666_s12, 8 }
  0x15   : > { %324 = vmatprep.subr.bf16.mxu0 (!%p160_p10), %v578_v5  ;;  %s192_s26 = scalar_lea.vmem (!%p160_p10), [#allocation3], %s492_s25  ;;  %s808_s3 = scalar_lea.hbm (!%p160_p10), %s855_s2, %s515_s28 }
  0x16   : > { %s194_s27 = scalar_select %p193_p11, %s666_s12, 1 }
  0x17   : > { %s677_s12 = smov [#allocation3]  }
  0x18   : > { %325 = vmatpush1.bf16.msra.mxu0 %v580_v6  ;;  %s493_s4 = sshll.u32 %s194_s27, 3  ;;  %s389_s27 = sshll.u32 %s192_s26, 4  ;;  %s803_s27 = int_to_ptr.vmem [resolvable:$true] %s389_s27 }
  0x19   : > { %326 = vmatprep.subr.bf16.mxu0 %v581_v7  ;;  %s199_s18 = scalar_lea.vmem %s853_s0, %s493_s4  ;;  %s373_s4 = scalar_lea.sflag [#allocation4], %s190_s24 }
  0x1a   : > { %v222_v17 = vld [vmem:[%s199_s18] sm:$0xff]  ;;  %s596_s5 = scalar_lea.vmem %s803_s27, 256  ;;  %s600_s6 = sshll.u32 %s677_s12, 4  ;;  %s601_s6 = int_to_ptr.vmem [resolvable:$false] %s600_s6 }
  0x1b   : > { %v223_v18 = vpack.c.bf16 %v222_v17, %v222_v17  ;;  %p597_p12 = scmp.ne.s32.totalorder %s803_s27, %s596_s5  ;;  %s602_s7 = scalar_lea.vmem %s601_s6, 512 }
  0x1c   : > { %327 = vmatpush1.bf16.msra.mxu0 %v583_v8  ;;  %p603_p1 = scmp.lt.s32.totalorder %s803_s27, %s601_s6  ;;  %p604_p2 = scmp.lt.s32.totalorder %s602_s7, %s596_s5 }
  0x1d   : > { %328 = vmatprep.subr.bf16.mxu0 %v584_v9  ;;  %p598_p13 = pnand %p597_p12, %p733_p4 }
  0x1e   : > { %p605_p3 = por %p604_p2, %p603_p1 }
  0x1f   : > { %p599_p0 = pneg %p598_p13 }
  0x20   : > { %329 = vmatpush1.bf16.msra.mxu0 %v586_v10 }
  0x21   : > { %330 = vmatprep.subr.bf16.mxu0 %v587_v11  ;;  %p606_p5 = pnand %p605_p3, %p599_p0 }
  0x24   : > { %331 = vmatpush1.bf16.msra.mxu0 %v589_v12 }
  0x25   : > { %332 = vmatprep.subr.bf16.mxu0 %v590_v13 }
  0x28   : > { %333 = vmatpush1.bf16.msra.mxu0 %v592_v14 }
  0x29   : > { %334 = vmatprep.subr.bf16.mxu0 %v593_v15 }
  0x2c   : > { %335 = vmatpush1.bf16.msra.mxu0 %v595_v16 }
  0x2f   : > { %353 = vmatmul.mubr.bf16.vlgmr.msra.gmra.mrb[0].mxu0 %v223_v18 }
 0x102   : > { %v354_v19 = vpop.f32.mrb[0].mxu0 }
 0x103   : > { %370 = vst [vmem:[%s192_s26] sm:$0xff] %v354_v19  ;;  %v356_v20 = vpop.f32.mrb[1].mxu0 }
 0x104   : > { %371 = vst [vmem:[%s192_s26 + $0x8] sm:$0xff] %v356_v20  ;;  %v358_v21 = vpop.f32.mrb[2].mxu0 }
 0x105   : > { %v359_v22 = vpop.f32.mrb[3].mxu0 }
 0x106   : > { %609 = shalt.err (!%p606_p5)
}
 0x107   : > { %s610_s8 = scalar_lea.hbm %s808_s3, 256  ;;  %s614_s18 = scalar_lea.hbm %s855_s2, 512 }
 0x108   : > { %p611_p6 = scmp.ne.s32.totalorder %s808_s3, %s610_s8  ;;  %p615_p10 = scmp.lt.u32.totalorder %s808_s3, %s855_s2 }
 0x109   : > { %p616_p11 = scmp.lt.u32.totalorder %s614_s18, %s610_s8  ;;  %p618_p13 = scmp.lt.u32.totalorder %s610_s8, %s808_s3 }
 0x10a   : > { %p612_p7 = pnand %p611_p6, %p733_p4 }
 0x10b   : > { %p617_p12 = por %p616_p11, %p615_p10 }
 0x10c   : > { %p613_p9 = pneg %p612_p7 }
 0x10d   : > { %p619_p0 = por %p618_p13, %p617_p12 }
 0x10f   : > { %p620_p1 = pnand %p619_p0, %p613_p9 }
 0x111   : > { %623 = shalt.err (!%p620_p1)
}
 0x112   : > { %516 = dma.vmem_to_hbm [thread:$0]  (%p733_p4), %s803_s27, 256, %s808_s3, %s373_s4  }
 0x113 PF: > { %p522_p2 = scmp.ge.s32.totalorder %s674_s14, 2  ;;  %s401_s24 = sand.u32 1, %s654_s9  }
 0x114   : > { %s402_s25 = scalar_lea.sflag [#allocation4], %s401_s24 }
 0x115   : > { %p519_p3 = pnand %p522_p2, %p740_p8 }
 0x117   : > { %649 = dma.done.wait (!%p519_p3), %s402_s25, 256  }
 0x118   : > { %651 = vsyncadd (!%p519_p3), %s402_s25, 4294967040  ;;  %s15_s14 = sadd.s32 1, %s674_s14   ;;  %s858_s9 = smov %s658_s10 }
 0x119   : > { %p12_p5 = scmp.ge.s32.totalorder %s15_s14, 4   ;;  %s859_s10 = smov %s662_s11 }
 0x11a   : > { %s860_s11 = smov %s746_s22  ;;  %s861_s12 = smov %s670_s13 }
 0x11b   : > { %s862_s13 = smov %s864_s17  ;;  %14 = sbr.rel (!%p12_p5) target bundleno = 4 (0x4), region = 74 }
 0x122   :  { %407 = vsyncpa [#allocation4], 1 }
 0x123   :  { %409 = vsyncpa [#allocation4 + $0x1], 1 }

</bundles_post_ra>
